<compile_context>
chip_gen: v7x
topology: tpu7x:2x2x1
jax: 0.10.0
libtpu: 0.0.40
codegen_flags: <defaults>
</compile_context>

<pallas_src>
import jax
import jax.numpy as jnp
from jax.experimental import pallas as pl
from jax.experimental.pallas import tpu as pltpu

# Static model sizes (small, consistent with the module's forward semantics).
IN_FEATURES = 8
HIDDEN = 32
OUT_FEATURES = 3
DEPTH = 2
HEADS = 2
D_HEAD = HIDDEN // HEADS
N_NODES = 16            # nodes in each input graph
N_SAMPLES = 4           # walk samples produced per RUM layer (collapses under placeholder)
LN_EPS = 1e-5
SELF_SUPERVISE_WEIGHT = 0.05
LANES = 128
GRAPH_BLOCK = 8         # graphs per grid step; use 16-64 on v6e/v7x with large B

# ---- parameter-slab row layout (all rows 128 lanes wide, zero padded) ----
R_W_IN = 0                    # (8, 128)   rows   0..7   : fc_in weight (8x32 used)
R_BIAS = 8                    # (16, 128)  rows   8..23  : 9 bias/scale rows used
R_WALK_W1 = 24                # (128, 128) rows  24..151 : fused walk_feat/gate layer 1
R_WALK_W2 = 152               # (128, 128) rows 152..279 : block-diag walk layer 2
R_ATTN_W1 = 280               # (128, 128) rows 280..407 : fused attn_feat/gate layer 1
R_ATTN_W2 = 408               # (128, 128) rows 408..535 : block-diag attn layer 2
R_FO_W1 = 536                 # (128, 128) rows 536..663 : fc_out linear 1
R_FO_W2 = 664                 # (128, 128) rows 664..791 : fc_out linear 2 (32x3 used)
SLAB_ROWS = 792               # multiple of 8 sublanes


def _elu(x):
    return jnp.where(x > 0, x, jnp.exp(jnp.minimum(x, 0.0)) - 1.0)


def _silu(x):
    return x * (1.0 / (1.0 + jnp.exp(-x)))


def rum_graph_regression_kernel(h_ref, slab_ref, out_ref):
    f32 = jnp.float32
    gb = h_ref.shape[0]
    m = gb * N_NODES

    # ---- resident weight slab views (full 128-lane rows; no masked lane loads) ----
    w_in = slab_ref[R_W_IN:R_W_IN + 8, :]                     # (8, 128)
    bias = slab_ref[R_BIAS:R_BIAS + 16, :]                    # one aligned value load
    b_in, ln_g, ln_b = bias[0:1, :], bias[1:2, :], bias[2:3, :]
    walk_b1, walk_b2 = bias[3:4, :], bias[4:5, :]
    attn_b1, attn_b2 = bias[5:6, :], bias[6:7, :]
    fo_b1, fo_b2 = bias[7:8, :], bias[8:9, :]
    walk_w1 = slab_ref[R_WALK_W1:R_WALK_W1 + LANES, :]        # (128, 128)
    walk_w2 = slab_ref[R_WALK_W2:R_WALK_W2 + LANES, :]
    attn_w1 = slab_ref[R_ATTN_W1:R_ATTN_W1 + LANES, :]
    attn_w2 = slab_ref[R_ATTN_W2:R_ATTN_W2 + LANES, :]
    fo_w1 = slab_ref[R_FO_W1:R_FO_W1 + LANES, :]
    fo_w2 = slab_ref[R_FO_W2:R_FO_W2 + LANES, :]

    # Hoisted lane mask selecting the real hidden lanes (0..HIDDEN-1).
    feat_mask = jax.lax.broadcasted_iota(jnp.int32, (1, LANES), 1) < HIDDEN

    # ---- fc_in over all GB graphs at once: (GB*N, IN) @ (IN, 128) ----
    h0 = h_ref[...].reshape(m, IN_FEATURES)
    h2 = jnp.dot(h0, w_in, preferred_element_type=f32) + b_in          # (m, 128)

    # ---- RUM layer stack ----
    # TODO(synk): RUMLayer (DGL random-walk sampling + RNN walk encoder) source is
    # unavailable; modeled as a broadcast of the node matrix over the walk-sample
    # axis.  Under that placeholder the inter-layer (SiLU -> mean over walks)
    # collapses to SiLU on the node matrix and the walk tensor never needs to be
    # materialized.
    for _ in range(1, DEPTH):
        h2 = _silu(h2)

    # ---- single-pass LayerNorm over the hidden dim (padded lanes are zero;
    #      zero-padded gamma/beta keep them zero afterwards) ----
    inv_h = 1.0 / HIDDEN
    mu = jnp.sum(h2, axis=-1, keepdims=True) * inv_h
    ex2 = jnp.sum(h2 * h2, axis=-1, keepdims=True) * inv_h
    var = ex2 - mu * mu
    h_ln = (h2 - mu) * jax.lax.rsqrt(var + LN_EPS) * ln_g + ln_b       # (m, 128)

    # ---- walk_pool (Multi_Head_Attention over walk samples) ----
    # Placeholder RUM layer broadcasts nodes over walk samples, so the per-head
    # gate softmax over identical samples is exactly uniform and the pooled
    # output equals the per-node walk_feat MLP output.  The fused matmul still
    # computes the gate lanes (32:34); they are masked off afterwards.
    h1 = _elu(jnp.dot(h_ln, walk_w1, preferred_element_type=f32) + walk_b1)  # (m, 128)
    fg = jnp.dot(h1, walk_w2, preferred_element_type=f32) + walk_b2          # (m, 128)
    hp = jnp.where(feat_mask, fg, 0.0)                                       # keep feat lanes

    # ---- attn_pool: GlobalAttentionPooling over the nodes of each graph ----
    a1 = _elu(jnp.dot(hp, attn_w1, preferred_element_type=f32) + attn_b1)    # (m, 128)
    fg2 = (jnp.dot(a1, attn_w2, preferred_element_type=f32) + attn_b2
           ).reshape(gb, N_NODES, LANES)                                     # feat 0:32, gate lane 32
    gate = fg2[:, :, HIDDEN:HIDDEN + 1]                                      # (gb, N, 1)
    gate_max = jnp.max(gate, axis=1, keepdims=True)
    gate_exp = jnp.exp(gate - gate_max)
    denom = jnp.sum(gate_exp, axis=1, keepdims=True)
    gate_sm = gate_exp * pl.reciprocal(denom, approx=True)                   # (gb, N, 1)
    readout = jnp.sum(gate_sm * fg2, axis=1)                                 # (gb, 128)
    readout = jnp.where(feat_mask, readout, 0.0)

    # ---- fc_out: ELU -> Linear(H,H) -> ELU -> Dropout(id) -> Linear(H,OUT) ----
    x = _elu(readout)
    x = _elu(jnp.dot(x, fo_w1, preferred_element_type=f32) + fo_b1)
    out = jnp.dot(x, fo_w2, preferred_element_type=f32) + fo_b2              # (gb, 128)
    out_ref[...] = out                                                       # unmasked lane-dense store


def rum_graph_regression_forward(h_batch, slab, gb=GRAPH_BLOCK):
    """h_batch: (B, N_NODES, IN_FEATURES) node features, one graph per batch entry."""
    B = h_batch.shape[0]
    b_pad = ((B + gb - 1) // gb) * gb
    if b_pad != B:
        h_batch = jnp.pad(h_batch, ((0, b_pad - B), (0, 0), (0, 0)))
    num_steps = b_pad // gb
    m = gb * N_NODES

    # Advisory cost hint for XLA scheduling around the custom call.
    flops = num_steps * (2 * m * IN_FEATURES * LANES
                         + 4 * 2 * m * LANES * LANES
                         + 2 * 2 * gb * LANES * LANES)
    transcendentals = num_steps * m * LANES * 4
    bytes_accessed = (b_pad * N_NODES * IN_FEATURES + slab.size + b_pad * LANES) * 4

    out = pl.pallas_call(
        rum_graph_regression_kernel,
        out_shape=jax.ShapeDtypeStruct((b_pad, LANES), jnp.float32),
        grid=(num_steps,),
        in_specs=[
            pl.BlockSpec((gb, N_NODES, IN_FEATURES), lambda b: (b, 0, 0)),
            pl.BlockSpec((SLAB_ROWS, LANES), lambda b: (0, 0)),   # weights stay resident
        ],
        out_specs=pl.BlockSpec((gb, LANES), lambda b: (b, 0)),
        compiler_params=pltpu.CompilerParams(dimension_semantics=("parallel",)),
        cost_estimate=pl.CostEstimate(flops=int(flops),
                                      transcendentals=int(transcendentals),
                                      bytes_accessed=int(bytes_accessed)),
    )(h_batch, slab)
    # TODO(synk): self-supervision loss originates in the unavailable RUMLayer;
    # with the placeholder layers it is exactly 0.
    loss = jnp.zeros((), jnp.float32) * SELF_SUPERVISE_WEIGHT
    return out[:B, :OUT_FEATURES], loss


def init_params_slab(key):
    """PyTorch-Linear-style init, fused and packed into one (SLAB_ROWS, 128) slab."""
    keys = jax.random.split(key, 22)
    it = iter(keys)

    def lin(in_d, out_d):
        # PyTorch Linear stores weight (out,in); we keep the (in,out) transpose so
        # kernel matmuls are x @ W (== x @ W^T + b of the torch module).
        bound = 1.0 / (in_d ** 0.5)
        w = jax.random.uniform(next(it), (in_d, out_d), jnp.float32, -bound, bound)
        b = jax.random.uniform(next(it), (1, out_d), jnp.float32, -bound, bound)
        return w, b

    w_in, b_in = lin(IN_FEATURES, HIDDEN)
    ln_g = jnp.ones((1, HIDDEN), jnp.float32)
    ln_b = jnp.zeros((1, HIDDEN), jnp.float32)
    # TODO(synk): feat_nn/gate_nn definitions unavailable; assumed 2-layer MLP with ELU.
    wf_w1, wf_b1 = lin(HIDDEN, HIDDEN)      # walk_feat MLP
    wf_w2, wf_b2 = lin(HIDDEN, HIDDEN)
    wg_w1, wg_b1 = lin(HIDDEN, HIDDEN)      # walk_gate MLP (-> heads)
    wg_w2, wg_b2 = lin(HIDDEN, HEADS)
    af_w1, af_b1 = lin(HIDDEN, HIDDEN)      # attn_feat MLP
    af_w2, af_b2 = lin(HIDDEN, HIDDEN)
    ag_w1, ag_b1 = lin(HIDDEN, HIDDEN)      # attn_gate MLP (-> 1)
    ag_w2, ag_b2 = lin(HIDDEN, 1)
    fo_w1, fo_b1 = lin(HIDDEN, HIDDEN)      # fc_out Sequential linears
    fo_w2, fo_b2 = lin(HIDDEN, OUT_FEATURES)

    slab = jnp.zeros((SLAB_ROWS, LANES), jnp.float32)

    # fc_in weight
    slab = slab.at[R_W_IN:R_W_IN + IN_FEATURES, 0:HIDDEN].set(w_in)

    # bias / scale rows (zero padded to 128 lanes)
    slab = slab.at[R_BIAS + 0, 0:HIDDEN].set(b_in[0])
    slab = slab.at[R_BIAS + 1, 0:HIDDEN].set(ln_g[0])
    slab = slab.at[R_BIAS + 2, 0:HIDDEN].set(ln_b[0])
    slab = slab.at[R_BIAS + 3, 0:HIDDEN].set(wf_b1[0])
    slab = slab.at[R_BIAS + 3, HIDDEN:2 * HIDDEN].set(wg_b1[0])
    slab = slab.at[R_BIAS + 4, 0:HIDDEN].set(wf_b2[0])
    slab = slab.at[R_BIAS + 4, HIDDEN:HIDDEN + HEADS].set(wg_b2[0])
    slab = slab.at[R_BIAS + 5, 0:HIDDEN].set(af_b1[0])
    slab = slab.at[R_BIAS + 5, HIDDEN:2 * HIDDEN].set(ag_b1[0])
    slab = slab.at[R_BIAS + 6, 0:HIDDEN].set(af_b2[0])
    slab = slab.at[R_BIAS + 6, HIDDEN:HIDDEN + 1].set(ag_b2[0])
    slab = slab.at[R_BIAS + 7, 0:HIDDEN].set(fo_b1[0])
    slab = slab.at[R_BIAS + 8, 0:OUT_FEATURES].set(fo_b2[0])

    # fused walk_feat/walk_gate MLP: shared first layer, block-diagonal second layer
    slab = slab.at[R_WALK_W1:R_WALK_W1 + HIDDEN, 0:HIDDEN].set(wf_w1)
    slab = slab.at[R_WALK_W1:R_WALK_W1 + HIDDEN, HIDDEN:2 * HIDDEN].set(wg_w1)
    slab = slab.at[R_WALK_W2:R_WALK_W2 + HIDDEN, 0:HIDDEN].set(wf_w2)
    slab = slab.at[R_WALK_W2 + HIDDEN:R_WALK_W2 + 2 * HIDDEN,
                   HIDDEN:HIDDEN + HEADS].set(wg_w2)

    # fused attn_feat/attn_gate MLP
    slab = slab.at[R_ATTN_W1:R_ATTN_W1 + HIDDEN, 0:HIDDEN].set(af_w1)
    slab = slab.at[R_ATTN_W1:R_ATTN_W1 + HIDDEN, HIDDEN:2 * HIDDEN].set(ag_w1)
    slab = slab.at[R_ATTN_W2:R_ATTN_W2 + HIDDEN, 0:HIDDEN].set(af_w2)
    slab = slab.at[R_ATTN_W2 + HIDDEN:R_ATTN_W2 + 2 * HIDDEN,
                   HIDDEN:HIDDEN + 1].set(ag_w2)

    # fc_out linears (lane/row zero padded)
    slab = slab.at[R_FO_W1:R_FO_W1 + HIDDEN, 0:HIDDEN].set(fo_w1)
    slab = slab.at[R_FO_W2:R_FO_W2 + HIDDEN, 0:OUT_FEATURES].set(fo_w2)
    return slab


if __name__ == "__main__":
    key = jax.random.PRNGKey(0)
    k_h, k_p = jax.random.split(key)
    B = 32                                    # 4 grid steps of GRAPH_BLOCK=8 graphs
    h = jax.random.normal(k_h, (B, N_NODES, IN_FEATURES), jnp.float32)
    slab = init_params_slab(k_p)

    out, loss = rum_graph_regression_forward(h, slab)
    out = jax.block_until_ready(out)
    loss = jax.block_until_ready(loss)

    assert out.shape == (B, OUT_FEATURES)
    assert bool(jnp.all(jnp.isfinite(out)))
    print("KERNEL_OK")
</pallas_src>

<mosaic_0001>
module attributes {stable_mosaic.version = 11 : i64} {
  func.func @rum_graph_regression_kernel(%arg0: i32, %arg1: memref<8x16x8xf32, #tpu.memory_space<vmem>>, %arg2: memref<792x128xf32, #tpu.memory_space<vmem>>, %arg3: memref<8x128xf32, #tpu.memory_space<vmem>>) attributes {dimension_semantics = [#tpu.dimension_semantics<parallel>], iteration_bounds = array<i64: 4>, scalar_prefetch = 0 : i64, scratch_operands = 0 : i64, tpu.core_type = #tpu.core_type<tc>, window_params = [{transform_indices = @transform_0, window_bounds = array<i64: 8, 16, 8>}, {pipeline_mode = #tpu.pipeline_mode<synchronous>, transform_indices = @transform_1, window_bounds = array<i64: 792, 128>}, {transform_indices = @transform_2, window_bounds = array<i64: 8, 128>}]} {
    %c0 = arith.constant 0 : index
    %c0_0 = arith.constant 0 : index
    %0 = vector.load %arg2[%c0, %c0_0] : memref<792x128xf32, #tpu.memory_space<vmem>>, vector<8x128xf32>
    %c8 = arith.constant 8 : index
    %c0_1 = arith.constant 0 : index
    %1 = vector.load %arg2[%c8, %c0_1] : memref<792x128xf32, #tpu.memory_space<vmem>>, vector<16x128xf32>
    %2 = vector.extract_strided_slice %1 {offsets = [0, 0], sizes = [1, 128], strides = [1, 1]} : vector<16x128xf32> to vector<1x128xf32>
    %3 = vector.extract_strided_slice %1 {offsets = [1, 0], sizes = [1, 128], strides = [1, 1]} : vector<16x128xf32> to vector<1x128xf32>
    %4 = vector.extract_strided_slice %1 {offsets = [2, 0], sizes = [1, 128], strides = [1, 1]} : vector<16x128xf32> to vector<1x128xf32>
    %5 = vector.extract_strided_slice %1 {offsets = [3, 0], sizes = [1, 128], strides = [1, 1]} : vector<16x128xf32> to vector<1x128xf32>
    %6 = vector.extract_strided_slice %1 {offsets = [4, 0], sizes = [1, 128], strides = [1, 1]} : vector<16x128xf32> to vector<1x128xf32>
    %7 = vector.extract_strided_slice %1 {offsets = [5, 0], sizes = [1, 128], strides = [1, 1]} : vector<16x128xf32> to vector<1x128xf32>
    %8 = vector.extract_strided_slice %1 {offsets = [6, 0], sizes = [1, 128], strides = [1, 1]} : vector<16x128xf32> to vector<1x128xf32>
    %9 = vector.extract_strided_slice %1 {offsets = [7, 0], sizes = [1, 128], strides = [1, 1]} : vector<16x128xf32> to vector<1x128xf32>
    %10 = vector.extract_strided_slice %1 {offsets = [8, 0], sizes = [1, 128], strides = [1, 1]} : vector<16x128xf32> to vector<1x128xf32>
    %c24 = arith.constant 24 : index
    %c0_2 = arith.constant 0 : index
    %11 = vector.load %arg2[%c24, %c0_2] : memref<792x128xf32, #tpu.memory_space<vmem>>, vector<128x128xf32>
    %c152 = arith.constant 152 : index
    %c0_3 = arith.constant 0 : index
    %12 = vector.load %arg2[%c152, %c0_3] : memref<792x128xf32, #tpu.memory_space<vmem>>, vector<128x128xf32>
    %c280 = arith.constant 280 : index
    %c0_4 = arith.constant 0 : index
    %13 = vector.load %arg2[%c280, %c0_4] : memref<792x128xf32, #tpu.memory_space<vmem>>, vector<128x128xf32>
    %c408 = arith.constant 408 : index
    %c0_5 = arith.constant 0 : index
    %14 = vector.load %arg2[%c408, %c0_5] : memref<792x128xf32, #tpu.memory_space<vmem>>, vector<128x128xf32>
    %c536 = arith.constant 536 : index
    %c0_6 = arith.constant 0 : index
    %15 = vector.load %arg2[%c536, %c0_6] : memref<792x128xf32, #tpu.memory_space<vmem>>, vector<128x128xf32>
    %c664 = arith.constant 664 : index
    %c0_7 = arith.constant 0 : index
    %16 = vector.load %arg2[%c664, %c0_7] : memref<792x128xf32, #tpu.memory_space<vmem>>, vector<128x128xf32>
    %17 = tpu.iota {dimensions = array<i32: 1>} : vector<1x128xi32>
    %c32_i32 = arith.constant 32 : i32
    %18 = vector.broadcast %c32_i32 : i32 to vector<1x128xi32>
    %19 = arith.cmpi slt, %17, %18 : vector<1x128xi32>
    %c0_8 = arith.constant 0 : index
    %c0_9 = arith.constant 0 : index
    %c0_10 = arith.constant 0 : index
    %20 = vector.load %arg1[%c0_8, %c0_9, %c0_10] : memref<8x16x8xf32, #tpu.memory_space<vmem>>, vector<8x16x8xf32>
    %21 = vector.shape_cast %20 : vector<8x16x8xf32> to vector<128x8xf32>
    %cst = arith.constant dense<0.000000e+00> : vector<128x128xf32>
    %22 = tpu.matmul %21, %0, %cst {dimension_numbers = #tpu.dot_dimension_numbers<[1], [0], [0], [1], [0, 0, 1, 1], [], []>} : vector<128x8xf32>, vector<8x128xf32>, vector<128x128xf32> -> vector<128x128xf32>
    %23 = vector.broadcast %2 : vector<1x128xf32> to vector<128x128xf32>
    %24 = arith.addf %22, %23 : vector<128x128xf32>
    %cst_11 = arith.constant 0.000000e+00 : f32
    %25 = vector.broadcast %cst_11 : f32 to vector<128x128xf32>
    %26 = arith.subf %25, %24 : vector<128x128xf32>
    %27 = math.exp %26 : vector<128x128xf32>
    %cst_12 = arith.constant 1.000000e+00 : f32
    %28 = vector.broadcast %cst_12 : f32 to vector<128x128xf32>
    %29 = arith.addf %28, %27 : vector<128x128xf32>
    %cst_13 = arith.constant 1.000000e+00 : f32
    %30 = vector.broadcast %cst_13 : f32 to vector<128x128xf32>
    %31 = arith.divf %30, %29 : vector<128x128xf32>
    %32 = arith.mulf %24, %31 : vector<128x128xf32>
    %cst_14 = arith.constant dense<0.000000e+00> : vector<128xf32>
    %33 = vector.multi_reduction <add>, %32, %cst_14 [1] : vector<128x128xf32> to vector<128xf32>
    %34 = vector.shape_cast %33 : vector<128xf32> to vector<128x1xf32>
    %cst_15 = arith.constant 3.125000e-02 : f32
    %35 = vector.broadcast %cst_15 : f32 to vector<128x1xf32>
    %36 = arith.mulf %34, %35 : vector<128x1xf32>
    %37 = arith.mulf %32, %32 : vector<128x128xf32>
    %cst_16 = arith.constant dense<0.000000e+00> : vector<128xf32>
    %38 = vector.multi_reduction <add>, %37, %cst_16 [1] : vector<128x128xf32> to vector<128xf32>
    %39 = vector.shape_cast %38 : vector<128xf32> to vector<128x1xf32>
    %cst_17 = arith.constant 3.125000e-02 : f32
    %40 = vector.broadcast %cst_17 : f32 to vector<128x1xf32>
    %41 = arith.mulf %39, %40 : vector<128x1xf32>
    %42 = arith.mulf %36, %36 : vector<128x1xf32>
    %43 = arith.subf %41, %42 : vector<128x1xf32>
    %44 = vector.broadcast %36 : vector<128x1xf32> to vector<128x128xf32>
    %45 = arith.subf %32, %44 : vector<128x128xf32>
    %cst_18 = arith.constant 9.99999974E-6 : f32
    %46 = vector.broadcast %cst_18 : f32 to vector<128x1xf32>
    %47 = arith.addf %43, %46 : vector<128x1xf32>
    %48 = math.rsqrt %47 : vector<128x1xf32>
    %49 = vector.broadcast %48 : vector<128x1xf32> to vector<128x128xf32>
    %50 = arith.mulf %45, %49 : vector<128x128xf32>
    %51 = vector.broadcast %3 : vector<1x128xf32> to vector<128x128xf32>
    %52 = arith.mulf %50, %51 : vector<128x128xf32>
    %53 = vector.broadcast %4 : vector<1x128xf32> to vector<128x128xf32>
    %54 = arith.addf %52, %53 : vector<128x128xf32>
    %cst_19 = arith.constant dense<0.000000e+00> : vector<128x128xf32>
    %55 = tpu.matmul %54, %11, %cst_19 {dimension_numbers = #tpu.dot_dimension_numbers<[1], [0], [0], [1], [0, 0, 1, 1], [], []>} : vector<128x128xf32>, vector<128x128xf32>, vector<128x128xf32> -> vector<128x128xf32>
    %56 = vector.broadcast %5 : vector<1x128xf32> to vector<128x128xf32>
    %57 = arith.addf %55, %56 : vector<128x128xf32>
    %cst_20 = arith.constant 0.000000e+00 : f32
    %58 = vector.broadcast %cst_20 : f32 to vector<128x128xf32>
    %59 = arith.cmpf ogt, %57, %58 : vector<128x128xf32>
    %cst_21 = arith.constant 0.000000e+00 : f32
    %60 = vector.broadcast %cst_21 : f32 to vector<128x128xf32>
    %61 = arith.minimumf %57, %60 : vector<128x128xf32>
    %62 = math.exp %61 : vector<128x128xf32>
    %cst_22 = arith.constant 1.000000e+00 : f32
    %63 = vector.broadcast %cst_22 : f32 to vector<128x128xf32>
    %64 = arith.subf %62, %63 : vector<128x128xf32>
    %65 = arith.select %59, %57, %64 : vector<128x128xi1>, vector<128x128xf32>
    %cst_23 = arith.constant dense<0.000000e+00> : vector<128x128xf32>
    %66 = tpu.matmul %65, %12, %cst_23 {dimension_numbers = #tpu.dot_dimension_numbers<[1], [0], [0], [1], [0, 0, 1, 1], [], []>} : vector<128x128xf32>, vector<128x128xf32>, vector<128x128xf32> -> vector<128x128xf32>
    %67 = vector.broadcast %6 : vector<1x128xf32> to vector<128x128xf32>
    %68 = arith.addf %66, %67 : vector<128x128xf32>
    %cst_24 = arith.constant 0.000000e+00 : f32
    %69 = vector.shape_cast %19 : vector<1x128xi1> to vector<1x128xi1>
    %70 = vector.broadcast %69 : vector<1x128xi1> to vector<128x128xi1>
    %71 = vector.broadcast %cst_24 : f32 to vector<128x128xf32>
    %72 = arith.select %70, %68, %71 : vector<128x128xi1>, vector<128x128xf32>
    %cst_25 = arith.constant dense<0.000000e+00> : vector<128x128xf32>
    %73 = tpu.matmul %72, %13, %cst_25 {dimension_numbers = #tpu.dot_dimension_numbers<[1], [0], [0], [1], [0, 0, 1, 1], [], []>} : vector<128x128xf32>, vector<128x128xf32>, vector<128x128xf32> -> vector<128x128xf32>
    %74 = vector.broadcast %7 : vector<1x128xf32> to vector<128x128xf32>
    %75 = arith.addf %73, %74 : vector<128x128xf32>
    %cst_26 = arith.constant 0.000000e+00 : f32
    %76 = vector.broadcast %cst_26 : f32 to vector<128x128xf32>
    %77 = arith.cmpf ogt, %75, %76 : vector<128x128xf32>
    %cst_27 = arith.constant 0.000000e+00 : f32
    %78 = vector.broadcast %cst_27 : f32 to vector<128x128xf32>
    %79 = arith.minimumf %75, %78 : vector<128x128xf32>
    %80 = math.exp %79 : vector<128x128xf32>
    %cst_28 = arith.constant 1.000000e+00 : f32
    %81 = vector.broadcast %cst_28 : f32 to vector<128x128xf32>
    %82 = arith.subf %80, %81 : vector<128x128xf32>
    %83 = arith.select %77, %75, %82 : vector<128x128xi1>, vector<128x128xf32>
    %cst_29 = arith.constant dense<0.000000e+00> : vector<128x128xf32>
    %84 = tpu.matmul %83, %14, %cst_29 {dimension_numbers = #tpu.dot_dimension_numbers<[1], [0], [0], [1], [0, 0, 1, 1], [], []>} : vector<128x128xf32>, vector<128x128xf32>, vector<128x128xf32> -> vector<128x128xf32>
    %85 = vector.broadcast %8 : vector<1x128xf32> to vector<128x128xf32>
    %86 = arith.addf %84, %85 : vector<128x128xf32>
    %87 = vector.shape_cast %86 : vector<128x128xf32> to vector<8x16x128xf32>
    %88 = vector.extract_strided_slice %87 {offsets = [0, 0, 32], sizes = [8, 16, 1], strides = [1, 1, 1]} : vector<8x16x128xf32> to vector<8x16x1xf32>
    %cst_30 = arith.constant dense<0xFF800000> : vector<8x1xf32>
    %89 = vector.multi_reduction <maximumf>, %88, %cst_30 [1] : vector<8x16x1xf32> to vector<8x1xf32>
    %90 = vector.shape_cast %89 : vector<8x1xf32> to vector<8x1x1xf32>
    %91 = vector.broadcast %90 : vector<8x1x1xf32> to vector<8x16x1xf32>
    %92 = arith.subf %88, %91 : vector<8x16x1xf32>
    %93 = math.exp %92 : vector<8x16x1xf32>
    %cst_31 = arith.constant dense<0.000000e+00> : vector<8x1xf32>
    %94 = vector.multi_reduction <add>, %93, %cst_31 [1] : vector<8x16x1xf32> to vector<8x1xf32>
    %95 = vector.shape_cast %94 : vector<8x1xf32> to vector<8x1x1xf32>
    %96 = tpu.reciprocal %95 {approx = true} : vector<8x1x1xf32> -> vector<8x1x1xf32>
    %97 = vector.broadcast %96 : vector<8x1x1xf32> to vector<8x16x1xf32>
    %98 = arith.mulf %93, %97 : vector<8x16x1xf32>
    %99 = vector.broadcast %98 : vector<8x16x1xf32> to vector<8x16x128xf32>
    %100 = arith.mulf %99, %87 : vector<8x16x128xf32>
    %cst_32 = arith.constant dense<0.000000e+00> : vector<8x128xf32>
    %101 = vector.multi_reduction <add>, %100, %cst_32 [1] : vector<8x16x128xf32> to vector<8x128xf32>
    %cst_33 = arith.constant 0.000000e+00 : f32
    %102 = vector.shape_cast %19 : vector<1x128xi1> to vector<1x128xi1>
    %103 = vector.broadcast %102 : vector<1x128xi1> to vector<8x128xi1>
    %104 = vector.broadcast %cst_33 : f32 to vector<8x128xf32>
    %105 = arith.select %103, %101, %104 : vector<8x128xi1>, vector<8x128xf32>
    %cst_34 = arith.constant 0.000000e+00 : f32
    %106 = vector.broadcast %cst_34 : f32 to vector<8x128xf32>
    %107 = arith.cmpf ogt, %105, %106 : vector<8x128xf32>
    %cst_35 = arith.constant 0.000000e+00 : f32
    %108 = vector.broadcast %cst_35 : f32 to vector<8x128xf32>
    %109 = arith.minimumf %105, %108 : vector<8x128xf32>
    %110 = math.exp %109 : vector<8x128xf32>
    %cst_36 = arith.constant 1.000000e+00 : f32
    %111 = vector.broadcast %cst_36 : f32 to vector<8x128xf32>
    %112 = arith.subf %110, %111 : vector<8x128xf32>
    %113 = arith.select %107, %105, %112 : vector<8x128xi1>, vector<8x128xf32>
    %cst_37 = arith.constant dense<0.000000e+00> : vector<8x128xf32>
    %114 = tpu.matmul %113, %15, %cst_37 {dimension_numbers = #tpu.dot_dimension_numbers<[1], [0], [0], [1], [0, 0, 1, 1], [], []>} : vector<8x128xf32>, vector<128x128xf32>, vector<8x128xf32> -> vector<8x128xf32>
    %115 = vector.broadcast %9 : vector<1x128xf32> to vector<8x128xf32>
    %116 = arith.addf %114, %115 : vector<8x128xf32>
    %cst_38 = arith.constant 0.000000e+00 : f32
    %117 = vector.broadcast %cst_38 : f32 to vector<8x128xf32>
    %118 = arith.cmpf ogt, %116, %117 : vector<8x128xf32>
    %cst_39 = arith.constant 0.000000e+00 : f32
    %119 = vector.broadcast %cst_39 : f32 to vector<8x128xf32>
    %120 = arith.minimumf %116, %119 : vector<8x128xf32>
    %121 = math.exp %120 : vector<8x128xf32>
    %cst_40 = arith.constant 1.000000e+00 : f32
    %122 = vector.broadcast %cst_40 : f32 to vector<8x128xf32>
    %123 = arith.subf %121, %122 : vector<8x128xf32>
    %124 = arith.select %118, %116, %123 : vector<8x128xi1>, vector<8x128xf32>
    %cst_41 = arith.constant dense<0.000000e+00> : vector<8x128xf32>
    %125 = tpu.matmul %124, %16, %cst_41 {dimension_numbers = #tpu.dot_dimension_numbers<[1], [0], [0], [1], [0, 0, 1, 1], [], []>} : vector<8x128xf32>, vector<128x128xf32>, vector<8x128xf32> -> vector<8x128xf32>
    %126 = vector.broadcast %10 : vector<1x128xf32> to vector<8x128xf32>
    %127 = arith.addf %125, %126 : vector<8x128xf32>
    %c0_42 = arith.constant 0 : index
    %c0_43 = arith.constant 0 : index
    %128 = vector.load %arg3[%c0_42, %c0_43] : memref<8x128xf32, #tpu.memory_space<vmem>>, vector<8x128xf32>
    tpu.vector_store %arg3[%c0_42, %c0_43], %127 {strides = array<i32>} : memref<8x128xf32, #tpu.memory_space<vmem>>, vector<8x128xf32>,
    return
  }
  func.func @transform_0(%arg0: i32) -> (i32, i32, i32) {
    %c0_i32 = arith.constant 0 : i32
    %c0_i32_0 = arith.constant 0 : i32
    %c0_i32_1 = arith.constant 0 : i32
    return %arg0, %c0_i32, %c0_i32_0 : i32, i32, i32
  }
  func.func @transform_1(%arg0: i32) -> (i32, i32) {
    %c0_i32 = arith.constant 0 : i32
    %c0_i32_0 = arith.constant 0 : i32
    %c0_i32_1 = arith.constant 0 : i32
    return %c0_i32, %c0_i32_0 : i32, i32
  }
  func.func @transform_2(%arg0: i32) -> (i32, i32) {
    %c0_i32 = arith.constant 0 : i32
    %c0_i32_0 = arith.constant 0 : i32
    return %arg0, %c0_i32 : i32, i32
  }
}

</mosaic_0001>

<bundles_post_ra>
// kernel: tpu_custom_call.1
= control target key start
LH: loop header
LB: loop body
LE: loop exit
PB: predicated region body
PF: predicated region fallthrough
CT: control target
= control target key end

     0   :  { %7 = vsyncpa [#allocation3], 0  ;;  %s4161_s0 = inlined_call_operand.vmem [shape: f32[32,16,8], index: 0, kind: input, shape index: {}]   ;;  %s4162_s1 = inlined_call_operand.hbm [shape: f32[792,128], index: 1, kind: input, shape index: {}]   ;;  %s4163_s2 = inlined_call_operand.hbm [shape: f32[32,128], index: 2, kind: output, shape index: {}]  }
   0x1   :  { %8 = vsyncpa [#allocation4], 0 }
   0x2   :  { %10 = vsyncpa [#allocation4 + $0x1], 0  ;;  %s3430_s9 = smov 0   ;;  %s3432_s10 = smov 0  }
   0x3   :  { %s3434_s11 = smov 0   ;;  %s3436_s12 = smov 0  }
   0x4 LB: > { %s3451_s13 = sadd.s32 4294967295, %s3405_s12   ;;  %s2283_s14 = sadd.s32 4294967294, %s3405_s12   ;;  %s3405_s12 = sphi %s3436_s12, %s4179_s12   ;;  %s3401_s11 = sphi %s3434_s11, %s4178_s11   ;;  %s3397_s10 = sphi %s3432_s10, %s4177_s10   ;;  %s3393_s9 = sphi %s3430_s9, %s4176_s9  }
   0x5   : > { %s3455_s15 = sadd.s32 1, %s3405_s12   ;;  %s70_s16 = sadd.s32 1, %s3401_s11 }
   0x6   : > { %s67_s17 = ssub.s32 %s3405_s12, %s3455_s15  ;;  %p80_p0 = scmp.ne.s32.totalorder %s3401_s11, %s3397_s10 }
   0x7   : > { %p68_p1 = scmp.eq.s32.totalorder %s67_s17, 0  ;;  %p81_p2 = scmp.eq.s32.totalorder %s3451_s13, 3 }
   0x8   : > { %p86_p3 = scmp.ne.s32.totalorder %s3397_s10, %s3393_s9  ;;  %p87_p4 = scmp.eq.s32.totalorder %s2283_s14, 3 }
   0x9   : > { %s3466_s18 = scalar_select %p68_p1, %s3401_s11, %s70_s16  }
   0xa   : > { %p3468_p5 = por %p81_p2, %p80_p0  ;;  %p3472_p6 = por %p87_p4, %p86_p3 }
   0xb   : > { %p2284_p7 = scmp.ge.s32.totalorder %s3405_s12, 1  ;;  %p94_p8 = scmp.lt.s32.totalorder %s3405_s12, 5 }
   0xc   : > { %s4167_s19 = scalar_select %p3468_p5, 1, 0 }
   0xd   : > { %s4168_s20 = scalar_select %p3472_p6, 1, 0 }
   0xe   : > { %p4164_p9 = scmp.eq.s32.totalorder %s3451_s13, 0  ;;  %p3479_p10 = pnand %p2284_p7, %p94_p8 }
   0xf   : > { %s3407_s22 = smov [#allocation2]   ;;  %s3311_s27 = scalar_lea.hbm %s4162_s1, 12672 }
  0x10   : > { %s4169_s21 = scalar_select %p3479_p10, 1, 0 }
  0x11   : > { %s106_s23 = sshll.u32 %s3407_s22, 4  ;;  %p3045_p11 = pneg %p3479_p10  ;;  %s107_s23 = int_to_ptr.vmem [resolvable:$true] %s106_s23 }
  0x12   : > { %p3312_p13 = scmp.ne.s32.totalorder %s4162_s1, %s3311_s27  ;;  %p3318_p3 = scmp.lt.u32.totalorder %s3311_s27, %s4162_s1 }
  0x13   : > { %p3487_p12 = pnand %p4164_p9, %p3045_p11 }
  0x15   : > { %p3313_p0 = pneg %p3487_p12 }
  0x17   : > { %p3314_p1 = pnand %p3313_p0, %p3312_p13 }
  0x19   : > { %p3315_p2 = pneg %p3314_p1 }
  0x1b   : > { %p3320_p4 = pnand %p3318_p3, %p3315_p2 }
  0x1d   : > { %3323 = shalt.err (!%p3320_p4)
}
  0x1e   : > { %s3324_s4 = scalar_lea.vmem %s107_s23, 12672  ;;  %p3332_p9 = scmp.lt.s32.totalorder %s107_s23, %s107_s23 }
  0x1f   : > { %p3325_p7 = scmp.ne.s32.totalorder %s107_s23, %s3324_s4  ;;  %p3333_p6 = scmp.lt.s32.totalorder %s3324_s4, %s3324_s4 }
  0x21   : > { %p3327_p8 = pnand %p3325_p7, %p3313_p0  ;;  %p3334_p5 = por %p3333_p6, %p3332_p9 }
  0x23   : > { %p3328_p11 = pneg %p3327_p8 }
  0x25   : > { %p3335_p10 = pnand %p3334_p5, %p3328_p11 }
  0x27   : > { %3338 = shalt.err (!%p3335_p10)
}
  0x28   : > { %s3408_s5 = smov 128   ;;  %s3409_s6 = smov 8  }
  0x29   : > { %3048 = dma.hbm_to_vmem [thread:$0]  (!%p3487_p12), %s4162_s1, 12672, %s107_s23, [#allocation3], %s3408_s5, %s3408_s5, %s3409_s6  }
  0x2a   : > { %p4171_p13 = scmp.ne.s32.totalorder %s4169_s21, 0 }
  0x2b   : > { %p4172_p1 = scmp.eq.s32.totalorder (!%p4171_p13), %s3451_s13, 0 }
  0x2c   : > { %132 = sbr.rel (%p4171_p13) target bundleno = 2113 (0x841), region = 28 }
  0x33   : > { %3384 = dma.done.wait (%p4172_p1), [#allocation3], 12672   ;;  %p4173_p0 = pmov %p4172_p1 }
  0x34   : > { %s2290_s14 = sshll.u32 %s3451_s13, 3  ;;  %vm284_vm0 = vcmask 64512   ;;  %v162_v0 = vld [vmem:[#allocation2] sm:$0xff]  ;;  %v165_v17 = vld [vmem:[#allocation2 + $0x18] sm:$0xff]  ;;  %v261_v20 = vlaneseq  ;;  %v3555_v23 = vld [vmem:[#allocation2 + $0x8] sm:$0xff]  ;;  %s152_s21 = sand.u32 1, %s3397_s10  }
  0x35   : > { %3386 = vsyncadd (%p4173_p0), [#allocation3], 4294954624  ;;  %p156_p5 = scmp.lt.s32.totalorder %s2290_s14, 31  ;;  %2543 = vmatprep.subr.mxu0 %v162_v0  ;;  %v166_v18 = vld [vmem:[#allocation2 + $0x20] sm:$0xff]  ;;  %s2289_s23 = sshll.u32 %s152_s21, 3 }
  0x36   : > { %2544 = vmatpush3.msra.mxu0 %v162_v0  ;;  %v2863_v19 = vpack.c.bf16 %v166_v18, %v165_v17  ;;  %v3552_v21 = vshrl.u32 %v261_v20, 7  ;;  %s2360_s25 = sshll.u32 %s3451_s13, 7  ;;  %s154_s26 = scalar_lea.vmem [#allocation5], %s2289_s23 }
  0x37   : > { %s4181_s14 = smov (!%p156_p5, %s2290_s14), 31  ;;  %s2212_s27 = sshll.u32 %s154_s26, 4  ;;  %s4121_s27 = int_to_ptr.vmem [resolvable:$true] %s2212_s27 }
  0x38   : > { %s2363_s16 = sshll.u32 %s4181_s14, 4  ;;  %2864 = vmatprep.subr.bf16.mxu1 %v2863_v19  ;;  %v282_v22 = vsub.s32 0, %v3552_v21  ;;  %s4119_s30 = scalar_lea.hbm %s4163_s2, %s2360_s25 }
  0x39   : > { %s3517_s24 = scalar_lea.vmem %s4161_s0, %s2363_s16  ;;  %2866 = vmatpush3.bf16.msra.mxu1 %v2863_v19  ;;  %s2199_s3 = scalar_lea.sflag [#allocation4], %s152_s21 }
  0x3a   : > { %v264_v1 = vld [vmem:[%s3517_s24] sm:$0xff]  ;;  %v265_v2 = vld [vmem:[%s3517_s24 + $0x8] sm:$0xff]  ;;  %v266_v3 = vld [vmem:[%s3517_s24 + $0x10] sm:$0xff]  ;;  %v3560_v24 = vrot.slane %v3555_v23, %v282_v22  ;;  %s3339_s4 = scalar_lea.vmem %s4121_s27, 128  ;;  %p4174_p9 = scmp.ne.s32.totalorder %s4167_s19, 0 }
  0x3b   : > { %2545 = vmatprep.mubr.msk.f32.mxu0 %vm284_vm0, %v264_v1  ;;  %v267_v4 = vld [vmem:[%s3517_s24 + $0x18] sm:$0xff]  ;;  %v268_v5 = vld [vmem:[%s3517_s24 + $0x20] sm:$0xff]  ;;  %v269_v6 = vld [vmem:[%s3517_s24 + $0x28] sm:$0xff]  ;;  %p3340_p6 = scmp.ne.s32.totalorder %s4121_s27, %s3339_s4  ;;  %s3414_s13 = smov [#allocation5]  }
  0x3c   : > { %2546 = vmatmul.mubr.msk.f32.vlgmr.msra.gmra.mrb[0].mxu0 %vm284_vm0, %v265_v2  ;;  %v270_v7 = vld [vmem:[%s3517_s24 + $0x30] sm:$0xff]  ;;  %v271_v8 = vld [vmem:[%s3517_s24 + $0x38] sm:$0xff]  ;;  %v272_v9 = vld [vmem:[%s3517_s24 + $0x40] sm:$0xff]  ;;  %s3343_s5 = sshll.u32 %s3414_s13, 4  ;;  %s3344_s5 = int_to_ptr.vmem [resolvable:$false] %s3343_s5 }
  0x3d   : > { %2548 = vmatprep.mubr.msk.f32.mxu0 %vm284_vm0, %v266_v3  ;;  %v273_v10 = vld [vmem:[%s3517_s24 + $0x48] sm:$0xff]  ;;  %v274_v11 = vld [vmem:[%s3517_s24 + $0x50] sm:$0xff]  ;;  %v275_v12 = vld [vmem:[%s3517_s24 + $0x58] sm:$0xff]  ;;  %p3341_p10 = pnand %p3340_p6, %p4174_p9  ;;  %s3345_s6 = scalar_lea.vmem %s3344_s5, 256 }
  0x3e   : > { %v276_v13 = vld [vmem:[%s3517_s24 + $0x60] sm:$0xff]  ;;  %v277_v14 = vld [vmem:[%s3517_s24 + $0x68] sm:$0xff]  ;;  %v278_v15 = vld [vmem:[%s3517_s24 + $0x70] sm:$0xff]  ;;  %p3346_p2 = scmp.lt.s32.totalorder %s4121_s27, %s3344_s5  ;;  %p3347_p3 = scmp.lt.s32.totalorder %s3345_s6, %s3339_s4 }
  0x3f   : > { %v279_v16 = vld [vmem:[%s3517_s24 + $0x78] sm:$0xff]  ;;  %p3342_p12 = pneg %p3341_p10 }
  0x40   : > { %2549 = vmatmul.mubr.msk.f32.gmra.mrb[2].mxu0 %vm284_vm0, %v267_v4  ;;  %p3348_p4 = por %p3347_p3, %p3346_p2 }
  0x41   : > { %2551 = vmatprep.mubr.msk.f32.mxu0 %vm284_vm0, %v268_v5 }
  0x42   : > { %p3349_p7 = pnand %p3348_p4, %p3342_p12 }
  0x44   : > { %2552 = vmatmul.mubr.msk.f32.gmra.mrb[4].mxu0 %vm284_vm0, %v269_v6 }
  0x45   : > { %2554 = vmatprep.mubr.msk.f32.mxu0 %vm284_vm0, %v270_v7 }
  0x48   : > { %2555 = vmatmul.mubr.msk.f32.gmra.mrb[6].mxu0 %vm284_vm0, %v271_v8 }
  0x49   : > { %2557 = vmatprep.mubr.msk.f32.mxu0 %vm284_vm0, %v272_v9 }
  0x4c   : > { %2558 = vmatmul.mubr.msk.f32.gmra.mrb[8].mxu0 %vm284_vm0, %v273_v10 }
  0x4d   : > { %2560 = vmatprep.mubr.msk.f32.mxu0 %vm284_vm0, %v274_v11 }
  0x50   : > { %2561 = vmatmul.mubr.msk.f32.gmra.mrb[10].mxu0 %vm284_vm0, %v275_v12 }
  0x51   : > { %2563 = vmatprep.mubr.msk.f32.mxu0 %vm284_vm0, %v276_v13 }
  0x54   : > { %2564 = vmatmul.mubr.msk.f32.gmra.mrb[12].mxu0 %vm284_vm0, %v277_v14 }
  0x55   : > { %2566 = vmatprep.mubr.msk.f32.mxu0 %vm284_vm0, %v278_v15 }
  0x58   : > { %2567 = vmatmul.mubr.msk.f32.gmra.mrb[14].mxu0 %vm284_vm0, %v279_v16 }
 0x10f   : > { %v2547_v25 = vpop.f32.mrb[0].mxu0 }
 0x110   : > { %v3563_v26 = vadd.f32 %v2547_v25, %v3560_v24  ;;  %v399_v27 = vpop.f32.mrb[1].mxu0 }
 0x111   : > { %v3566_v28 = vadd.f32 %v399_v27, %v3560_v24 }
 0x112   : > { %v479_v29 = vsub.f32 0.0, %v3563_v26 }
 0x113   : > { %v478_v30 = vsub.f32 0.0, %v3566_v28  ;;  %v2550_v31 = vpop.f32.mrb[2].mxu0 }
 0x114   : > { %v496_v32 = vmul.f32 1.442695, %v479_v29  ;;  %v3571_v33 = vadd.f32 %v2550_v31, %v3560_v24  ;;  %v409_v34 = vpop.f32.mrb[3].mxu0 }
 0x115   : > { %v494_v35 = vmul.f32 1.442695, %v478_v30  ;;  %v3574_v36 = vadd.f32 %v409_v34, %v3560_v24 }
 0x116   : > { %3097 = vpow2.f32 %v496_v32  ;;  %v481_v37 = vsub.f32 0.0, %v3571_v33 }
 0x117   : > { %3099 = vpow2.f32 %v494_v35  ;;  %v480_v38 = vsub.f32 0.0, %v3574_v36  ;;  %v2553_v39 = vpop.f32.mrb[4].mxu0 }
 0x118   : > { %v500_v40 = vmul.f32 1.442695, %v481_v37  ;;  %v3579_v41 = vadd.f32 %v2553_v39, %v3560_v24  ;;  %v419_v42 = vpop.f32.mrb[5].mxu0 }
 0x119   : > { %v498_v43 = vmul.f32 1.442695, %v480_v38  ;;  %v3582_v44 = vadd.f32 %v419_v42, %v3560_v24 }
 0x11a   : > { %3101 = vpow2.f32 %v500_v40  ;;  %v483_v45 = vsub.f32 0.0, %v3579_v41 }
 0x11b   : > { %3103 = vpow2.f32 %v498_v43  ;;  %v482_v46 = vsub.f32 0.0, %v3582_v44  ;;  %v2556_v47 = vpop.f32.mrb[6].mxu0 }
 0x11c   : > { %v429_v48 = vpop.f32.mrb[7].mxu0  ;;  %v504_v51 = vmul.f32 1.442695, %v483_v45  ;;  %v3590_v52 = vadd.f32 %v2556_v47, %v3560_v24 }
 0x11d   : > { %v502_v49 = vmul.f32 1.442695, %v482_v46  ;;  %v3587_v50 = vadd.f32 %v429_v48, %v3560_v24 }
 0x11e   : > { %v485_v60 = vsub.f32 0.0, %v3590_v52 }
 0x11f   : > { %v2559_v53 = vpop.f32.mrb[8].mxu0  ;;  %3105 = vpow2.f32 %v502_v49  ;;  %v484_v55 = vsub.f32 0.0, %v3587_v50 }
 0x120   : > { %v3098_v54 = vpop.eup %3097  ;;  %v439_v56 = vpop.f32.mrb[9].mxu0  ;;  %3107 = vpow2.f32 %v504_v51  ;;  %v508_v4 = vmul.f32 1.442695, %v485_v60  ;;  %v3598_v5 = vadd.f32 %v2559_v53, %v3560_v24 }
 0x121   : > { %v3100_v57 = vpop.eup %3099  ;;  %v527_v58 = vadd.f32 1.0, %v3098_v54  ;;  %v506_v63 = vmul.f32 1.442695, %v484_v55  ;;  %v3595_v0 = vadd.f32 %v439_v56, %v3560_v24 }
 0x122   : > { %v526_v59 = vadd.f32 1.0, %v3100_v57  ;;  %v487_v11 = vsub.f32 0.0, %v3598_v5 }
 0x123   : > { %3109 = vrcp.f32 %v527_v58  ;;  %v2562_v61 = vpop.f32.mrb[10].mxu0  ;;  %v486_v8 = vsub.f32 0.0, %v3595_v0 }
 0x124   : > { %v3102_v62 = vpop.eup %3101  ;;  %3111 = vrcp.f32 %v526_v59  ;;  %v449_v1 = vpop.f32.mrb[11].mxu0  ;;  %v512_v27 = vmul.f32 1.442695, %v487_v11  ;;  %v3609_v29 = vadd.f32 %v2562_v61, %v3560_v24 }
 0x125   : > { %v3104_v2 = vpop.eup %3103  ;;  %v529_v6 = vadd.f32 1.0, %v3102_v62  ;;  %3113 = vpow2.f32 %v506_v63  ;;  %v510_v14 = vmul.f32 1.442695, %v486_v8  ;;  %v3603_v15 = vadd.f32 %v449_v1, %v3560_v24 }
 0x126   : > { %v528_v3 = vadd.f32 1.0, %v3104_v2  ;;  %v167_v2 = vld [vmem:[#allocation2 + $0x28] sm:$0xff] }
 0x127   : > { %v2565_v7 = vpop.f32.mrb[12].mxu0  ;;  %v488_v32 = vsub.f32 0.0, %v3603_v15 }
 0x128   : > { %v459_v9 = vpop.f32.mrb[13].mxu0  ;;  %3115 = vrcp.f32 %v528_v3  ;;  %v3629_v47 = vadd.f32 %v2565_v7, %v3560_v24  ;;  %v168_v3 = vld [vmem:[#allocation2 + $0x30] sm:$0xff] }
 0x129   : > { %v3106_v10 = vpop.eup %3105  ;;  %3117 = vpow2.f32 %v508_v4  ;;  %v514_v39 = vmul.f32 1.442695, %v488_v32  ;;  %v2867_v7 = vpack.c.bf16 %v168_v3, %v167_v2  ;;  %v172_v32 = vld [vmem:[#allocation2 + $0x50] sm:$0xff] }
 0x12a   : > { %3119 = vrcp.f32 %v529_v6  ;;  %v3108_v13 = vpop.eup %3107  ;;  %v530_v18 = vadd.f32 1.0, %v3106_v10  ;;  %v170_v10 = vld [vmem:[#allocation2 + $0x40] sm:$0xff] }
 0x12b   : > { %v2568_v12 = vpop.f32.mrb[14].mxu0  ;;  %v531_v30 = vadd.f32 1.0, %v3108_v13  ;;  %3121 = vpow2.f32 %v510_v14  ;;  %2868 = vmatprep.subr.bf16.mxu1 %v2867_v7 }
 0x12c   : > { %v469_v16 = vpop.f32.mrb[15].mxu0  ;;  %3123 = vrcp.f32 %v530_v18  ;;  %v3649_v63 = vadd.f32 %v2568_v12, %v3560_v24  ;;  %2870 = vmatpush3.bf16.msra.mxu1 %v2867_v7  ;;  %v179_v7 = vld [vmem:[#allocation2 + $0x88] sm:$0xff] }
 0x12d   : > { %v3110_v17 = vpop.eup %3109  ;;  %3125 = vpow2.f32 %v512_v27  ;;  %v3641_v57 = vadd.f32 %v469_v16, %v3560_v24 }
 0x12e   : > { %v3112_v19 = vpop.eup %3111  ;;  %v3606_v25 = vmul.f32 %v3110_v17, %v3563_v26  ;;  %v489_v26 = vsub.f32 0.0, %v3609_v29  ;;  %3127 = vrcp.f32 %v531_v30  ;;  %v493_v8 = vsub.f32 0.0, %v3649_v63  ;;  %v171_v30 = vld [vmem:[#allocation2 + $0x48] sm:$0xff] }
 0x12f   : > { %v3612_v31 = vmul.f32 %v3112_v19, %v3566_v28  ;;  %v3114_v35 = vpop.eup %3113  ;;  %v3620_v28 = vadd.f32 %v459_v9, %v3560_v24  ;;  %3129 = vpow2.f32 %v514_v39  ;;  %v492_v6 = vsub.f32 0.0, %v3641_v57  ;;  %v174_v39 = vld [vmem:[#allocation2 + $0x60] sm:$0xff] }
 0x130   : > { %592 = vadd.xlane.f32.xlu0 %v3606_v25  ;;  %v639_v34 = vmul.f32 %v3606_v25, %v3606_v25  ;;  %v532_v43 = vadd.f32 1.0, %v3114_v35  ;;  %v516_v46 = vmul.f32 1.442695, %v489_v26  ;;  %v524_v19 = vmul.f32 1.442695, %v493_v8 }
 0x131   : > { %v638_v40 = vmul.f32 %v3612_v31, %v3612_v31  ;;  %v490_v51 = vsub.f32 0.0, %v3620_v28  ;;  %v522_v12 = vmul.f32 1.442695, %v492_v6  ;;  %v2875_v35 = vpack.c.bf16 %v172_v32, %v171_v30  ;;  %v182_v30 = vld [vmem:[#allocation2 + $0xa0] sm:$0xff] }
 0x132   : > { %656 = vadd.xlane.f32.xlu1 %v639_v34  ;;  %v3116_v37 = vpop.eup %3115  ;;  %3131 = vrcp.f32 %v532_v43 }
 0x133   : > { %v3118_v38 = vpop.eup %3117  ;;  %v3626_v45 = vmul.f32 %v3116_v37, %v3574_v36  ;;  %3133 = vpow2.f32 %v516_v46  ;;  %v491_v36 = vsub.f32 0.0, %v3629_v47 }
 0x134   : > { %590 = vadd.xlane.f32.xlu0 %v3612_v31  ;;  %v3120_v42 = vpop.eup %3119  ;;  %v533_v48 = vadd.f32 1.0, %v3118_v38  ;;  %v173_v38 = vld [vmem:[#allocation2 + $0x58] sm:$0xff] }
 0x135   : > { %v3632_v49 = vmul.f32 %v3120_v42, %v3571_v33  ;;  %v3122_v53 = vpop.eup %3121  ;;  %v640_v54 = vmul.f32 %v3626_v45, %v3626_v45  ;;  %v518_v33 = vmul.f32 1.442695, %v490_v51  ;;  %v520_v62 = vmul.f32 1.442695, %v491_v36  ;;  %v176_v36 = vld [vmem:[#allocation2 + $0x70] sm:$0xff] }
 0x136   : > { %654 = vadd.xlane.f32.xlu1 %v638_v40  ;;  %v3124_v55 = vpop.eup %3123  ;;  %3135 = vrcp.f32 %v533_v48  ;;  %v534_v60 = vadd.f32 1.0, %v3122_v53  ;;  %v2879_v42 = vpack.c.bf16 %v174_v39, %v173_v38  ;;  %v175_v53 = vld [vmem:[#allocation2 + $0x68] sm:$0xff] }
 0x137   : > { %v3126_v56 = vpop.eup %3125  ;;  %v641_v58 = vmul.f32 %v3632_v49, %v3632_v49  ;;  %v3646_v61 = vmul.f32 %v3124_v55, %v3582_v44  ;;  %3137 = vpow2.f32 %v518_v33  ;;  %v2883_v55 = vpack.c.bf16 %v176_v36, %v175_v53 }
 0x138   : > { %594 = vadd.xlane.f32.xlu0 %v3626_v45  ;;  %v3128_v59 = vpop.eup %3127  ;;  %v535_v1 = vadd.f32 1.0, %v3126_v56  ;;  %3139 = vrcp.f32 %v534_v60 }
 0x139   : > { %v3652_v4 = vmul.f32 %v3128_v59, %v3579_v41  ;;  %v3130_v44 = vpop.eup %3129  ;;  %3141 = vpow2.f32 %v520_v62  ;;  %v642_v24 = vmul.f32 %v3646_v61, %v3646_v61  ;;  %v169_v41 = vld [vmem:[#allocation2 + $0x38] sm:$0xff]  ;;  %v178_v59 = vld [vmem:[#allocation2 + $0x80] sm:$0xff] }
 0x13a   : > { %596 = vadd.xlane.f32.xlu1 %v3632_v49  ;;  %3143 = vrcp.f32 %v535_v1  ;;  %v2871_v14 = vpack.c.bf16 %v170_v10, %v169_v41  ;;  %v536_v17 = vadd.f32 1.0, %v3130_v44  ;;  %v180_v44 = vld [vmem:[#allocation2 + $0x90] sm:$0xff] }
 0x13b   : > { %v643_v13 = vmul.f32 %v3652_v4, %v3652_v4  ;;  %3145 = vpow2.f32 %v522_v12 }
 0x13c   : > { %658 = vadd.xlane.f32.xlu0 %v640_v54  ;;  %v3132_v9 = vpop.eup %3131  ;;  %2872 = vmatprep.subr.bf16.mxu1 %v2871_v14  ;;  %3147 = vrcp.f32 %v536_v17 }
 0x13d   : > { %v3134_v11 = vpop.eup %3133  ;;  %v3663_v18 = vmul.f32 %v3132_v9, %v3587_v50  ;;  %2874 = vmatpush3.bf16.msra.mxu1 %v2871_v14  ;;  %3149 = vpow2.f32 %v524_v19 }
 0x13e   : > { %660 = vadd.xlane.f32.xlu1 %v641_v58  ;;  %v537_v27 = vadd.f32 1.0, %v3134_v11  ;;  %2876 = vmatprep.subr.bf16.mxu1 %v2875_v35  ;;  %v177_v58 = vld [vmem:[#allocation2 + $0x78] sm:$0xff] }
 0x13f   : > { %v644_v50 = vmul.f32 %v3663_v18, %v3663_v18  ;;  %v2887_v62 = vpack.c.bf16 %v178_v59, %v177_v58 }
 0x140   : > { %598 = vadd.xlane.f32.xlu0 %v3646_v61  ;;  %v3136_v16 = vpop.eup %3135  ;;  %3151 = vrcp.f32 %v537_v27  ;;  %v181_v27 = vld [vmem:[#allocation2 + $0x98] sm:$0xff] }
 0x141   : > { %v3666_v34 = vmul.f32 %v3136_v16, %v3590_v52  ;;  %v3138_v26 = vpop.eup %3137  ;;  %2878 = vmatpush3.bf16.msra.mxu1 %v2875_v35  ;;  %v2895_v32 = vpack.c.bf16 %v182_v30, %v181_v27  ;;  %v184_v35 = vld [vmem:[#allocation2 + $0xb0] sm:$0xff] }
 0x142   : > { %600 = vadd.xlane.f32.xlu1 %v3652_v4  ;;  %v3140_v37 = vpop.eup %3139  ;;  %v538_v46 = vadd.f32 1.0, %v3138_v26  ;;  %2880 = vmatprep.subr.bf16.mxu1 %v2879_v42 }
 0x143   : > { %v3142_v52 = vpop.eup %3141  ;;  %v645_v40 = vmul.f32 %v3666_v34, %v3666_v34  ;;  %v3675_v48 = vmul.f32 %v3140_v37, %v3595_v0  ;;  %2896 = vmatprep.subr.bf16.mxu0 %v2895_v32 }
 0x144   : > { %662 = vadd.xlane.f32.xlu0 %v642_v24  ;;  %v3144_v43 = vpop.eup %3143  ;;  %v539_v51 = vadd.f32 1.0, %v3142_v52  ;;  %3153 = vrcp.f32 %v538_v46  ;;  %v2891_v24 = vpack.c.bf16 %v180_v44, %v179_v7  ;;  %2898 = vmatpush3.bf16.msra.mxu0 %v2895_v32 }
 0x145   : > { %2882 = vmatpush3.bf16.msra.mxu1 %v2879_v42  ;;  %v3678_v54 = vmul.f32 %v3144_v43, %v3598_v5  ;;  %v3146_v56 = vpop.eup %3145  ;;  %v646_v0 = vmul.f32 %v3675_v48, %v3675_v48 }
 0x146   : > { %664 = vadd.xlane.f32.xlu1 %v643_v13  ;;  %2884 = vmatprep.subr.bf16.mxu1 %v2883_v55  ;;  %v3148_v33 = vpop.eup %3147  ;;  %3155 = vrcp.f32 %v539_v51  ;;  %v540_v2 = vadd.f32 1.0, %v3146_v56 }
 0x147   : > { %v3150_v60 = vpop.eup %3149  ;;  %v647_v5 = vmul.f32 %v3678_v54, %v3678_v54  ;;  %v3687_v3 = vmul.f32 %v3148_v33, %v3603_v15 }
 0x148   : > { %602 = vadd.xlane.f32.xlu0 %v3663_v18  ;;  %v541_v6 = vadd.f32 1.0, %v3150_v60  ;;  %3157 = vrcp.f32 %v540_v2 }
 0x149   : > { %2886 = vmatpush3.bf16.msra.mxu1 %v2883_v55  ;;  %v648_v9 = vmul.f32 %v3687_v3, %v3687_v3 }
 0x14a   : > { %604 = vadd.xlane.f32.xlu1 %v3666_v34  ;;  %v3152_v1 = vpop.eup %3151  ;;  %2888 = vmatprep.subr.bf16.mxu1 %v2887_v62  ;;  %3159 = vrcp.f32 %v541_v6 }
 0x14b   : > { %v3690_v8 = vmul.f32 %v3152_v1, %v3609_v29 }
 0x14c   : > { %666 = vadd.xlane.f32.xlu0 %v644_v50  ;;  %v186_v50 = vld [vmem:[#allocation2 + $0xc0] sm:$0xff] }
 0x14d   : > { %2890 = vmatpush3.bf16.msra.mxu1 %v2887_v62  ;;  %v649_v41 = vmul.f32 %v3690_v8, %v3690_v8 }
 0x14e   : > { %668 = vadd.xlane.f32.xlu1 %v645_v40  ;;  %2892 = vmatprep.subr.bf16.mxu1 %v2891_v24  ;;  %v3154_v15 = vpop.eup %3153 }
 0x14f   : > { %v3699_v29 = vmul.f32 %v3154_v15, %v3620_v28  ;;  %v800_v15 = vsub.s32 1, %v3552_v21 }
 0x150   : > { %606 = vadd.xlane.f32.xlu0 %v3675_v48  ;;  %v3156_v10 = vpop.eup %3155 }
 0x151   : > { %2894 = vmatpush3.bf16.msra.mxu1 %v2891_v24  ;;  %v3702_v11 = vmul.f32 %v3156_v10, %v3629_v47  ;;  %v650_v12 = vmul.f32 %v3699_v29, %v3699_v29  ;;  %v3733_v30 = vrot.slane %v3555_v23, %v800_v15 }
 0x152   : > { %608 = vadd.xlane.f32.xlu1 %v3678_v54  ;;  %v3158_v13 = vpop.eup %3157 }
 0x153   : > { %v651_v14 = vmul.f32 %v3702_v11, %v3702_v11  ;;  %v3711_v28 = vmul.f32 %v3158_v13, %v3641_v57  ;;  %v183_v57 = vld [vmem:[#allocation2 + $0xa8] sm:$0xff] }
 0x154   : > { %670 = vadd.xlane.f32.xlu0 %v646_v0  ;;  %v3160_v16 = vpop.eup %3159  ;;  %v2899_v26 = vpack.c.bf16 %v184_v35, %v183_v57  ;;  %v820_v57 = vsub.s32 2, %v3552_v21 }
 0x155   : > { %v3714_v47 = vmul.f32 %v3160_v16, %v3649_v63  ;;  %v652_v17 = vmul.f32 %v3711_v28, %v3711_v28  ;;  %v185_v63 = vld [vmem:[#allocation2 + $0xb8] sm:$0xff] }
 0x156   : > { %672 = vadd.xlane.f32.xlu1 %v647_v5  ;;  %2900 = vmatprep.subr.bf16.mxu0 %v2899_v26  ;;  %v2903_v37 = vpack.c.bf16 %v186_v50, %v185_v63 }
 0x157   : > { %v653_v19 = vmul.f32 %v3714_v47, %v3714_v47  ;;  %2902 = vmatpush3.bf16.msra.mxu0 %v2899_v26 }
 0x158   : > { %610 = vadd.xlane.f32.xlu0 %v3687_v3  ;;  %2904 = vmatprep.subr.bf16.mxu0 %v2903_v37 }
 0x15a   : > { %612 = vadd.xlane.f32.xlu1 %v3690_v8 }
 0x15b   : > { %2906 = vmatpush3.bf16.msra.mxu0 %v2903_v37 }
 0x15c   : > { %674 = vadd.xlane.f32.xlu0 %v648_v9 }
 0x15e   : > { %676 = vadd.xlane.f32.xlu1 %v649_v41 }
 0x160   : > { %614 = vadd.xlane.f32.xlu0 %v3699_v29 }
 0x162   : > { %616 = vadd.xlane.f32.xlu1 %v3702_v11 }
 0x164   : > { %678 = vadd.xlane.f32.xlu0 %v650_v12 }
 0x166   : > { %680 = vadd.xlane.f32.xlu1 %v651_v14 }
 0x168   : > { %618 = vadd.xlane.f32.xlu0 %v3711_v28 }
 0x16a   : > { %620 = vadd.xlane.f32.xlu1 %v3714_v47 }
 0x16c   : > { %682 = vadd.xlane.f32.xlu0 %v652_v17 }
 0x16e   : > { %684 = vadd.xlane.f32.xlu1 %v653_v19 }
 0x1bd   : > { %v593_v38 = vpop.xlane.xlu0 %592 }
 0x1be   : > { %v623_v39 = vmul.f32 0.03125, %v593_v38 }
 0x1bf   : > { %v657_v52 = vpop.xlane.xlu1 %656 }
 0x1c0   : > { %v703_v40 = vmul.f32 %v623_v39, %v623_v39  ;;  %v687_v42 = vmul.f32 0.03125, %v657_v52  ;;  %v735_v16 = vsub.f32 %v3606_v25, %v623_v39 }
 0x1c1   : > { %v591_v43 = vpop.xlane.xlu0 %590 }
 0x1c2   : > { %v719_v46 = vsub.f32 %v687_v42, %v703_v40  ;;  %v622_v51 = vmul.f32 0.03125, %v591_v43  ;;  %v3742_v42 = vrot.slane %v3555_v23, %v820_v57 }
 0x1c3   : > { %v655_v53 = vpop.xlane.xlu1 %654 }
 0x1c4   : > { %v751_v36 = vadd.f32 1e-05, %v719_v46  ;;  %v702_v55 = vmul.f32 %v622_v51, %v622_v51  ;;  %v686_v56 = vmul.f32 0.03125, %v655_v53  ;;  %v734_v63 = vsub.f32 %v3612_v31, %v622_v51 }
 0x1c5   : > { %v595_v0 = vpop.xlane.xlu0 %594 }
 0x1c6   : > { %3161 = vrsqrt.f32 %v751_v36  ;;  %v718_v33 = vsub.f32 %v686_v56, %v702_v55  ;;  %v624_v58 = vmul.f32 0.03125, %v595_v0 }
 0x1c7   : > { %v597_v59 = vpop.xlane.xlu1 %596 }
 0x1c8   : > { %v750_v60 = vadd.f32 1e-05, %v718_v33  ;;  %v3722_v5 = vmul.f32 0.03125, %v597_v59  ;;  %v704_v1 = vmul.f32 %v624_v58, %v624_v58  ;;  %v736_v56 = vsub.f32 %v3626_v45, %v624_v58 }
 0x1c9   : > { %v659_v62 = vpop.xlane.xlu0 %658 }
 0x1ca   : > { %3163 = vrsqrt.f32 %v750_v60  ;;  %v688_v2 = vmul.f32 0.03125, %v659_v62  ;;  %v705_v7 = vmul.f32 %v3722_v5, %v3722_v5 }
 0x1cb   : > { %v661_v6 = vpop.xlane.xlu1 %660 }
 0x1cc   : > { %v720_v44 = vsub.f32 %v688_v2, %v704_v1  ;;  %v689_v24 = vmul.f32 0.03125, %v661_v6  ;;  %v737_v2 = vsub.f32 %v3632_v49, %v3722_v5 }
 0x1cd   : > { %v599_v9 = vpop.xlane.xlu0 %598 }
 0x1ce   : > { %v752_v41 = vadd.f32 1e-05, %v720_v44  ;;  %v721_v10 = vsub.f32 %v689_v24, %v705_v7  ;;  %v3727_v12 = vmul.f32 0.03125, %v599_v9 }
 0x1cf   : > { %v601_v13 = vpop.xlane.xlu1 %600 }
 0x1d0   : > { %v3162_v14 = vpop.eup %3161  ;;  %3165 = vrsqrt.f32 %v752_v41  ;;  %v753_v17 = vadd.f32 1e-05, %v721_v10  ;;  %v3730_v19 = vmul.f32 0.03125, %v601_v13  ;;  %v706_v32 = vmul.f32 %v3727_v12, %v3727_v12 }
 0x1d1   : > { %v663_v27 = vpop.xlane.xlu0 %662  ;;  %v783_v26 = vmul.f32 %v3162_v14, %v735_v16 }
 0x1d2   : > { %3167 = vrsqrt.f32 %v753_v17  ;;  %v690_v35 = vmul.f32 0.03125, %v663_v27  ;;  %v707_v37 = vmul.f32 %v3730_v19, %v3730_v19  ;;  %v738_v27 = vsub.f32 %v3646_v61, %v3727_v12 }
 0x1d3   : > { %v665_v50 = vpop.xlane.xlu1 %664  ;;  %v803_v36 = vmul.f32 %v3733_v30, %v783_v26 }
 0x1d4   : > { %v3164_v25 = vpop.eup %3163  ;;  %v722_v38 = vsub.f32 %v690_v35, %v706_v32  ;;  %v691_v39 = vmul.f32 0.03125, %v665_v50 }
 0x1d5   : > { %v603_v52 = vpop.xlane.xlu0 %602  ;;  %v782_v40 = vmul.f32 %v3164_v25, %v734_v63  ;;  %v823_v1 = vadd.f32 %v3742_v42, %v803_v36  ;;  %v739_v25 = vsub.f32 %v3652_v4, %v3730_v19 }
 0x1d6   : > { %v754_v43 = vadd.f32 1e-05, %v722_v38  ;;  %v723_v46 = vsub.f32 %v691_v39, %v707_v37  ;;  %v3744_v53 = vmul.f32 0.03125, %v603_v52 }
 0x1d7   : > { %v605_v55 = vpop.xlane.xlu1 %604  ;;  %v802_v31 = vmul.f32 %v3733_v30, %v782_v40 }
 0x1d8   : > { %3169 = vrsqrt.f32 %v754_v43  ;;  %v755_v51 = vadd.f32 1e-05, %v723_v46  ;;  %v3749_v0 = vmul.f32 0.03125, %v605_v55  ;;  %v708_v60 = vmul.f32 %v3744_v53, %v3744_v53 }
 0x1d9   : > { %v667_v33 = vpop.xlane.xlu0 %666  ;;  %v822_v59 = vadd.f32 %v3742_v42, %v802_v31 }
 0x1da   : > { %v3166_v23 = vpop.eup %3165  ;;  %3171 = vrsqrt.f32 %v755_v51  ;;  %v692_v62 = vmul.f32 0.03125, %v667_v33  ;;  %v709_v58 = vmul.f32 %v3749_v0, %v3749_v0  ;;  %v740_v33 = vsub.f32 %v3663_v18, %v3744_v53 }
 0x1db   : > { %2601 = vmatprep.mubr.f32.mxu1 %v822_v59  ;;  %v669_v6 = vpop.xlane.xlu1 %668  ;;  %v784_v7 = vmul.f32 %v3166_v23, %v736_v56 }
 0x1dc   : > { %v3168_v45 = vpop.eup %3167  ;;  %v724_v44 = vsub.f32 %v692_v62, %v708_v60  ;;  %v693_v24 = vmul.f32 0.03125, %v669_v6  ;;  %2602 = vmatmul.mubr.f32.vlgmr.msra.gmra.mrb[0].mxu1 %v823_v1  ;;  %v741_v6 = vsub.f32 %v3666_v34, %v3749_v0 }
 0x1dd   : > { %v607_v9 = vpop.xlane.xlu0 %606  ;;  %v804_v15 = vmul.f32 %v3733_v30, %v784_v7  ;;  %v785_v41 = vmul.f32 %v3168_v45, %v737_v2 }
 0x1de   : > { %v756_v10 = vadd.f32 1e-05, %v724_v44  ;;  %v725_v13 = vsub.f32 %v693_v24, %v709_v58  ;;  %v3760_v14 = vmul.f32 0.03125, %v607_v9 }
 0x1df   : > { %v609_v16 = vpop.xlane.xlu1 %608  ;;  %v824_v49 = vadd.f32 %v3742_v42, %v804_v15  ;;  %v805_v5 = vmul.f32 %v3733_v30, %v785_v41 }
 0x1e0   : > { %3173 = vrsqrt.f32 %v756_v10  ;;  %v757_v17 = vadd.f32 1e-05, %v725_v13  ;;  %v3766_v57 = vmul.f32 0.03125, %v609_v16  ;;  %v710_v63 = vmul.f32 %v3760_v14, %v3760_v14 }
 0x1e1   : > { %v671_v32 = vpop.xlane.xlu0 %670  ;;  %2604 = vmatprep.mubr.f32.mxu1 %v824_v49  ;;  %v825_v35 = vadd.f32 %v3742_v42, %v805_v5  ;;  %v742_v5 = vsub.f32 %v3675_v48, %v3760_v14 }
 0x1e2   : > { %v3170_v26 = vpop.eup %3169  ;;  %3175 = vrsqrt.f32 %v757_v17  ;;  %v694_v50 = vmul.f32 0.03125, %v671_v32  ;;  %v711_v61 = vmul.f32 %v3766_v57, %v3766_v57 }
 0x1e3   : > { %2605 = vmatmul.mubr.f32.gmra.mrb[2].mxu1 %v825_v35  ;;  %v673_v37 = vpop.xlane.xlu1 %672  ;;  %v786_v38 = vmul.f32 %v3170_v26, %v738_v27 }
 0x1e4   : > { %v3172_v39 = vpop.eup %3171  ;;  %v726_v12 = vsub.f32 %v694_v50, %v710_v63  ;;  %v695_v52 = vmul.f32 0.03125, %v673_v37  ;;  %v743_v50 = vsub.f32 %v3678_v54, %v3766_v57 }
 0x1e5   : > { %v611_v40 = vpop.xlane.xlu0 %610  ;;  %v806_v43 = vmul.f32 %v3733_v30, %v786_v38  ;;  %v787_v46 = vmul.f32 %v3172_v39, %v739_v25 }
 0x1e6   : > { %v758_v36 = vadd.f32 1e-05, %v726_v12  ;;  %v727_v55 = vsub.f32 %v695_v52, %v711_v61  ;;  %v3776_v31 = vmul.f32 0.03125, %v611_v40 }
 0x1e7   : > { %v613_v51 = vpop.xlane.xlu1 %612  ;;  %v826_v4 = vadd.f32 %v3742_v42, %v806_v43  ;;  %v807_v19 = vmul.f32 %v3733_v30, %v787_v46 }
 0x1e8   : > { %3177 = vrsqrt.f32 %v758_v36  ;;  %v759_v56 = vadd.f32 1e-05, %v727_v55  ;;  %v3782_v59 = vmul.f32 0.03125, %v613_v51  ;;  %v712_v1 = vmul.f32 %v3776_v31, %v3776_v31 }
 0x1e9   : > { %v675_v23 = vpop.xlane.xlu0 %674  ;;  %2607 = vmatprep.mubr.f32.mxu1 %v826_v4  ;;  %v827_v60 = vadd.f32 %v3742_v42, %v807_v19  ;;  %v744_v51 = vsub.f32 %v3687_v3, %v3776_v31 }
 0x1ea   : > { %v3174_v62 = vpop.eup %3173  ;;  %3179 = vrsqrt.f32 %v759_v56  ;;  %v696_v2 = vmul.f32 0.03125, %v675_v23  ;;  %v713_v18 = vmul.f32 %v3782_v59, %v3782_v59 }
 0x1eb   : > { %2608 = vmatmul.mubr.f32.gmra.mrb[4].mxu1 %v827_v60  ;;  %v677_v7 = vpop.xlane.xlu1 %676  ;;  %v788_v45 = vmul.f32 %v3174_v62, %v740_v33  ;;  %v745_v62 = vsub.f32 %v3690_v8, %v3782_v59 }
 0x1ec   : > { %v3176_v58 = vpop.eup %3175  ;;  %v728_v53 = vsub.f32 %v696_v2, %v712_v1  ;;  %v697_v44 = vmul.f32 0.03125, %v677_v7 }
 0x1ed   : > { %v615_v24 = vpop.xlane.xlu0 %614  ;;  %v808_v9 = vmul.f32 %v3733_v30, %v788_v45  ;;  %v789_v15 = vmul.f32 %v3176_v58, %v741_v6 }
 0x1ee   : > { %v760_v41 = vadd.f32 1e-05, %v728_v53  ;;  %v729_v10 = vsub.f32 %v697_v44, %v713_v18  ;;  %v3792_v13 = vmul.f32 0.03125, %v615_v24 }
 0x1ef   : > { %v617_v16 = vpop.xlane.xlu1 %616  ;;  %v828_v34 = vadd.f32 %v3742_v42, %v808_v9  ;;  %v809_v0 = vmul.f32 %v3733_v30, %v789_v15 }
 0x1f0   : > { %3181 = vrsqrt.f32 %v760_v41  ;;  %v761_v49 = vadd.f32 1e-05, %v729_v10  ;;  %v3798_v17 = vmul.f32 0.03125, %v617_v16  ;;  %v714_v26 = vmul.f32 %v3792_v13, %v3792_v13 }
 0x1f1   : > { %v679_v27 = vpop.xlane.xlu0 %678  ;;  %2610 = vmatprep.mubr.f32.mxu1 %v828_v34  ;;  %v829_v32 = vadd.f32 %v3742_v42, %v809_v0  ;;  %v746_v8 = vsub.f32 %v3699_v29, %v3792_v13 }
 0x1f2   : > { %v3178_v35 = vpop.eup %3177  ;;  %3183 = vrsqrt.f32 %v761_v49  ;;  %v698_v63 = vmul.f32 0.03125, %v679_v27  ;;  %v715_v48 = vmul.f32 %v3798_v17, %v3798_v17  ;;  %v747_v41 = vsub.f32 %v3702_v11, %v3798_v17 }
 0x1f3   : > { %2611 = vmatmul.mubr.f32.gmra.mrb[6].mxu1 %v829_v32  ;;  %v681_v25 = vpop.xlane.xlu1 %680  ;;  %v790_v37 = vmul.f32 %v3178_v35, %v742_v5 }
 0x1f4   : > { %v3180_v38 = vpop.eup %3179  ;;  %v730_v14 = vsub.f32 %v698_v63, %v714_v26  ;;  %v699_v39 = vmul.f32 0.03125, %v681_v25 }
 0x1f5   : > { %v619_v61 = vpop.xlane.xlu0 %618  ;;  %v810_v12 = vmul.f32 %v3733_v30, %v790_v37  ;;  %v791_v52 = vmul.f32 %v3180_v38, %v743_v50  ;;  %v188_v37 = vld [vmem:[#allocation2 + $0xd0] sm:$0xff] }
 0x1f6   : > { %v762_v40 = vadd.f32 1e-05, %v730_v14  ;;  %v731_v43 = vsub.f32 %v699_v39, %v715_v48  ;;  %v636_v46 = vmul.f32 0.03125, %v619_v61  ;;  %v190_v48 = vld [vmem:[#allocation2 + $0xe0] sm:$0xff]  ;;  %v191_v39 = vld [vmem:[#allocation2 + $0xe8] sm:$0xff]  ;;  %v192_v61 = vld [vmem:[#allocation2 + $0xf0] sm:$0xff] }
 0x1f7   : > { %v621_v36 = vpop.xlane.xlu1 %620  ;;  %v830_v55 = vadd.f32 %v3742_v42, %v810_v12  ;;  %v811_v54 = vmul.f32 %v3733_v30, %v791_v52  ;;  %v2915_v12 = vpack.c.bf16 %v192_v61, %v191_v39  ;;  %v194_v52 = vld [vmem:[#allocation2 + $0x100] sm:$0xff] }
 0x1f8   : > { %3185 = vrsqrt.f32 %v762_v40  ;;  %v763_v57 = vadd.f32 1e-05, %v731_v43  ;;  %v637_v4 = vmul.f32 0.03125, %v621_v36  ;;  %v716_v23 = vmul.f32 %v636_v46, %v636_v46  ;;  %v196_v43 = vld [vmem:[#allocation2 + $0x110] sm:$0xff]  ;;  %v197_v36 = vld [vmem:[#allocation2 + $0x118] sm:$0xff] }
 0x1f9   : > { %v683_v19 = vpop.xlane.xlu0 %682  ;;  %2613 = vmatprep.mubr.f32.mxu1 %v830_v55  ;;  %v831_v56 = vadd.f32 %v3742_v42, %v811_v54  ;;  %v748_v29 = vsub.f32 %v3711_v28, %v636_v46  ;;  %v187_v28 = vld [vmem:[#allocation2 + $0xc8] sm:$0xff]  ;;  %v198_v55 = vld [vmem:[#allocation2 + $0x120] sm:$0xff] }
 0x1fa   : > { %v3182_v33 = vpop.eup %3181  ;;  %3187 = vrsqrt.f32 %v763_v57  ;;  %v700_v60 = vmul.f32 0.03125, %v683_v19  ;;  %v717_v7 = vmul.f32 %v637_v4, %v637_v4  ;;  %v749_v32 = vsub.f32 %v3714_v47, %v637_v4  ;;  %v189_v47 = vld [vmem:[#allocation2 + $0xd8] sm:$0xff]  ;;  %v199_v54 = vld [vmem:[#allocation2 + $0x128] sm:$0xff] }
 0x1fb   : > { %2614 = vmatmul.mubr.f32.gmra.mrb[8].mxu1 %v831_v56  ;;  %v685_v1 = vpop.xlane.xlu1 %684  ;;  %v792_v2 = vmul.f32 %v3182_v33, %v744_v51  ;;  %v2907_v38 = vpack.c.bf16 %v188_v37, %v187_v28  ;;  %v2911_v14 = vpack.c.bf16 %v190_v48, %v189_v47  ;;  %v2927_v57 = vpack.c.bf16 %v198_v55, %v197_v36  ;;  %v200_v51 = vld [vmem:[#allocation2 + $0x130] sm:$0xff]  ;;  %v201_v19 = vld [vmem:[#allocation2 + $0x138] sm:$0xff]  ;;  %v202_v56 = vld [vmem:[#allocation2 + $0x140] sm:$0xff] }
 0x1fc   : > { %v3184_v6 = vpop.eup %3183  ;;  %v732_v45 = vsub.f32 %v700_v60, %v716_v23  ;;  %v701_v58 = vmul.f32 0.03125, %v685_v1  ;;  %v2931_v4 = vpack.c.bf16 %v200_v51, %v199_v54  ;;  %v2935_v33 = vpack.c.bf16 %v202_v56, %v201_v19  ;;  %v203_v23 = vld [vmem:[#allocation2 + $0x148] sm:$0xff]  ;;  %v204_v60 = vld [vmem:[#allocation2 + $0x150] sm:$0xff]  ;;  %v205_v1 = vld [vmem:[#allocation2 + $0x158] sm:$0xff] }
 0x1fd   : > { %v812_v3 = vmul.f32 %v3733_v30, %v792_v2  ;;  %v793_v31 = vmul.f32 %v3184_v6, %v745_v62  ;;  %2908 = vmatprep.subr.bf16.mxu0 %v2907_v38  ;;  %2928 = vmatprep.subr.bf16.mxu1 %v2927_v57  ;;  %v2939_v62 = vpack.c.bf16 %v204_v60, %v203_v23  ;;  %v206_v2 = vld [vmem:[#allocation2 + $0x160] sm:$0xff] }
 0x1fe   : > { %v764_v18 = vadd.f32 1e-05, %v732_v45  ;;  %v733_v53 = vsub.f32 %v701_v58, %v717_v7  ;;  %2910 = vmatpush3.bf16.msra.mxu0 %v2907_v38  ;;  %2930 = vmatpush3.bf16.msra.mxu1 %v2927_v57  ;;  %v2943_v6 = vpack.c.bf16 %v206_v2, %v205_v1  ;;  %v207_v7 = vld [vmem:[#allocation2 + $0x168] sm:$0xff]  ;;  %v208_v45 = vld [vmem:[#allocation2 + $0x170] sm:$0xff] }
 0x1ff   : > { %v832_v44 = vadd.f32 %v3742_v42, %v812_v3  ;;  %v813_v24 = vmul.f32 %v3733_v30, %v793_v31  ;;  %2912 = vmatprep.subr.bf16.mxu0 %v2911_v14  ;;  %2932 = vmatprep.subr.bf16.mxu1 %v2931_v4  ;;  %v2947_v58 = vpack.c.bf16 %v208_v45, %v207_v7  ;;  %v209_v3 = vld [vmem:[#allocation2 + $0x178] sm:$0xff]  ;;  %v210_v31 = vld [vmem:[#allocation2 + $0x180] sm:$0xff] }
 0x200   : > { %3189 = vrsqrt.f32 %v764_v18  ;;  %v765_v9 = vadd.f32 1e-05, %v733_v53  ;;  %v2951_v18 = vpack.c.bf16 %v210_v31, %v209_v3  ;;  %v840_v53 = vsub.s32 3, %v3552_v21 }
 0x201   : > { %2616 = vmatprep.mubr.f32.mxu1 %v832_v44  ;;  %v833_v59 = vadd.f32 %v3742_v42, %v813_v24  ;;  %v3834_v44 = vld [vmem:[#allocation2 + $0x8] sm:$0xff] }
 0x202   : > { %v3186_v15 = vpop.eup %3185  ;;  %3191 = vrsqrt.f32 %v765_v9  ;;  %2914 = vmatpush3.bf16.msra.mxu0 %v2911_v14  ;;  %2934 = vmatpush3.bf16.msra.mxu1 %v2931_v4  ;;  %v3837_v24 = vrot.slane %v3834_v44, %v840_v53 }
 0x203   : > { %2617 = vmatmul.mubr.f32.gmra.mrb[10].mxu1 %v833_v59  ;;  %v794_v10 = vmul.f32 %v3186_v15, %v746_v8  ;;  %2916 = vmatprep.subr.bf16.mxu0 %v2915_v12 }
 0x204   : > { %v3188_v16 = vpop.eup %3187  ;;  %2936 = vmatprep.subr.bf16.mxu1 %v2935_v33 }
 0x205   : > { %v814_v34 = vmul.f32 %v3733_v30, %v794_v10  ;;  %v795_v0 = vmul.f32 %v3188_v16, %v747_v41 }
 0x206   : > { %2918 = vmatpush3.bf16.msra.mxu0 %v2915_v12  ;;  %2938 = vmatpush3.bf16.msra.mxu1 %v2935_v33 }
 0x207   : > { %v834_v49 = vadd.f32 %v3742_v42, %v814_v34  ;;  %v815_v5 = vmul.f32 %v3733_v30, %v795_v0  ;;  %2940 = vmatprep.subr.bf16.mxu1 %v2939_v62 }
 0x209   : > { %2619 = vmatprep.mubr.f32.mxu1 %v834_v49  ;;  %v835_v13 = vadd.f32 %v3742_v42, %v815_v5 }
 0x20a   : > { %v3190_v27 = vpop.eup %3189  ;;  %2942 = vmatpush3.bf16.msra.mxu1 %v2939_v62 }
 0x20b   : > { %2620 = vmatmul.mubr.f32.gmra.mrb[12].mxu1 %v835_v13  ;;  %v796_v11 = vmul.f32 %v3190_v27, %v748_v29  ;;  %2944 = vmatprep.subr.bf16.mxu1 %v2943_v6 }
 0x20c   : > { %v3192_v17 = vpop.eup %3191 }
 0x20d   : > { %v816_v35 = vmul.f32 %v3733_v30, %v796_v11  ;;  %v797_v26 = vmul.f32 %v3192_v17, %v749_v32 }
 0x20e   : > { %2946 = vmatpush3.bf16.msra.mxu1 %v2943_v6 }
 0x20f   : > { %v836_v63 = vadd.f32 %v3742_v42, %v816_v35  ;;  %v817_v50 = vmul.f32 %v3733_v30, %v797_v26  ;;  %v193_v30 = vld [vmem:[#allocation2 + $0xf8] sm:$0xff]  ;;  %2948 = vmatprep.subr.bf16.mxu1 %v2947_v58 }
 0x210   : > { %v2919_v40 = vpack.c.bf16 %v194_v52, %v193_v30 }
 0x211   : > { %2622 = vmatprep.mubr.f32.mxu1 %v836_v63  ;;  %v837_v25 = vadd.f32 %v3742_v42, %v817_v50  ;;  %v195_v42 = vld [vmem:[#allocation2 + $0x108] sm:$0xff] }
 0x212   : > { %2920 = vmatprep.subr.bf16.mxu0 %v2919_v40  ;;  %v2923_v46 = vpack.c.bf16 %v196_v43, %v195_v42  ;;  %2950 = vmatpush3.bf16.msra.mxu1 %v2947_v58 }
 0x213   : > { %2623 = vmatmul.mubr.f32.gmra.mrb[14].mxu1 %v837_v25  ;;  %2922 = vmatpush3.bf16.msra.mxu0 %v2919_v40 }
 0x214   : > { %2924 = vmatprep.subr.bf16.mxu0 %v2923_v46  ;;  %2952 = vmatprep.subr.bf16.mxu1 %v2951_v18 }
 0x216   : > { %2954 = vmatpush3.bf16.msra.mxu1 %v2951_v18 }
 0x217   : > { %2926 = vmatpush3.bf16.msra.mxu0 %v2923_v46 }
 0x2af   : > { %v2603_v9 = vpop.f32.mrb[0].mxu1 }
 0x2b0   : > { %v914_v8 = vadd.f32 %v2603_v9, %v3837_v24  ;;  %v908_v59 = vpop.f32.mrb[1].mxu1 }
 0x2b1   : > { %v909_v15 = vadd.f32 %v908_v59, %v3837_v24 }
 0x2b2   : > { %v1004_v41 = vmin.f32 %v914_v8, 0.0  ;;  %vm988_vm2 = vcmp.gt.f32.partialorder %v914_v8, 0.0 }
 0x2b3   : > { %v1003_v10 = vmin.f32 %v909_v15, 0.0  ;;  %vm987_vm1 = vcmp.gt.f32.partialorder %v909_v15, 0.0 }
 0x2b4   : > { %v1021_v16 = vmul.f32 1.442695, %v1004_v41 }
 0x2b5   : > { %v1019_v34 = vmul.f32 1.442695, %v1003_v10 }
 0x2b6   : > { %3193 = vpow2.f32 %v1021_v16  ;;  %v2606_v0 = vpop.f32.mrb[2].mxu1 }
 0x2b7   : > { %3195 = vpow2.f32 %v1019_v34  ;;  %v924_v49 = vadd.f32 %v2606_v0, %v3837_v24  ;;  %v918_v5 = vpop.f32.mrb[3].mxu1 }
 0x2b8   : > { %v919_v29 = vadd.f32 %v918_v5, %v3837_v24 }
 0x2b9   : > { %v1006_v13 = vmin.f32 %v924_v49, 0.0  ;;  %vm990_vm4 = vcmp.gt.f32.partialorder %v924_v49, 0.0 }
 0x2ba   : > { %v1005_v27 = vmin.f32 %v919_v29, 0.0  ;;  %vm989_vm3 = vcmp.gt.f32.partialorder %v919_v29, 0.0 }
 0x2bb   : > { %v1025_v32 = vmul.f32 1.442695, %v1006_v13 }
 0x2bc   : > { %v1023_v11 = vmul.f32 1.442695, %v1005_v27 }
 0x2bd   : > { %3197 = vpow2.f32 %v1025_v32 }
 0x2be   : > { %3199 = vpow2.f32 %v1023_v11  ;;  %v2609_v17 = vpop.f32.mrb[4].mxu1 }
 0x2bf   : > { %v934_v35 = vadd.f32 %v2609_v17, %v3837_v24  ;;  %v928_v26 = vpop.f32.mrb[5].mxu1 }
 0x2c0   : > { %v3194_v63 = vpop.eup %3193  ;;  %v929_v50 = vadd.f32 %v928_v26, %v3837_v24 }
 0x2c1   : > { %v3196_v25 = vpop.eup %3195  ;;  %v2310_v28 = vadd.f32 -1.0, %v3194_v63  ;;  %v1008_v37 = vmin.f32 %v934_v35, 0.0  ;;  %vm992_vm6 = vcmp.gt.f32.partialorder %v934_v35, 0.0 }
 0x2c2   : > { %v1007_v38 = vmin.f32 %v929_v50, 0.0  ;;  %v2309_v47 = vadd.f32 -1.0, %v3196_v25  ;;  %vm991_vm5 = vcmp.gt.f32.partialorder %v929_v50, 0.0 }
 0x2c3   : > { %v1029_v48 = vmul.f32 1.442695, %v1008_v37  ;;  %v1068_v61 = vsel %vm988_vm2, %v914_v8, %v2310_v28 }
 0x2c4   : > { %v1027_v14 = vmul.f32 1.442695, %v1007_v38  ;;  %v1067_v39 = vsel %vm987_vm1, %v909_v15, %v2309_v47 }
 0x2c5   : > { %3201 = vpow2.f32 %v1029_v48  ;;  %2657 = vmatprep.mubr.f32.mxu0 %v1067_v39 }
 0x2c6   : > { %3203 = vpow2.f32 %v1027_v14  ;;  %v2612_v12 = vpop.f32.mrb[6].mxu1  ;;  %2658 = vmatmul.mubr.f32.vlgmr.msra.gmra.mrb[16].mxu0 %v1068_v61 }
 0x2c7   : > { %v3198_v30 = vpop.eup %3197  ;;  %v944_v52 = vadd.f32 %v2612_v12, %v3837_v24  ;;  %v938_v40 = vpop.f32.mrb[7].mxu1 }
 0x2c8   : > { %v3200_v42 = vpop.eup %3199  ;;  %v939_v43 = vadd.f32 %v938_v40, %v3837_v24  ;;  %v2312_v46 = vadd.f32 -1.0, %v3198_v30 }
 0x2c9   : > { %v1010_v36 = vmin.f32 %v944_v52, 0.0  ;;  %v2311_v55 = vadd.f32 -1.0, %v3200_v42  ;;  %vm994_vm8 = vcmp.gt.f32.partialorder %v944_v52, 0.0 }
 0x2ca   : > { %v1009_v54 = vmin.f32 %v939_v43, 0.0  ;;  %v1070_v19 = vsel %vm990_vm4, %v924_v49, %v2312_v46  ;;  %vm993_vm7 = vcmp.gt.f32.partialorder %v939_v43, 0.0 }
 0x2cb   : > { %v1033_v57 = vmul.f32 1.442695, %v1010_v36  ;;  %v1069_v51 = vsel %vm989_vm3, %v919_v29, %v2311_v55 }
 0x2cc   : > { %v1031_v4 = vmul.f32 1.442695, %v1009_v54  ;;  %2660 = vmatprep.mubr.f32.mxu0 %v1069_v51 }
 0x2cd   : > { %3205 = vpow2.f32 %v1033_v57  ;;  %2661 = vmatmul.mubr.f32.gmra.mrb[18].mxu0 %v1070_v19 }
 0x2ce   : > { %3207 = vpow2.f32 %v1031_v4  ;;  %v2615_v56 = vpop.f32.mrb[8].mxu1 }
 0x2cf   : > { %v3202_v33 = vpop.eup %3201  ;;  %v954_v23 = vadd.f32 %v2615_v56, %v3837_v24  ;;  %v948_v60 = vpop.f32.mrb[9].mxu1 }
 0x2d0   : > { %v3204_v62 = vpop.eup %3203  ;;  %v949_v1 = vadd.f32 %v948_v60, %v3837_v24  ;;  %v2314_v2 = vadd.f32 -1.0, %v3202_v33 }
 0x2d1   : > { %v1012_v6 = vmin.f32 %v954_v23, 0.0  ;;  %v2313_v7 = vadd.f32 -1.0, %v3204_v62  ;;  %vm996_vm10 = vcmp.gt.f32.partialorder %v954_v23, 0.0 }
 0x2d2   : > { %v1011_v45 = vmin.f32 %v949_v1, 0.0  ;;  %v1072_v18 = vsel %vm992_vm6, %v934_v35, %v2314_v2  ;;  %vm995_vm9 = vcmp.gt.f32.partialorder %v949_v1, 0.0 }
 0x2d3   : > { %v1037_v58 = vmul.f32 1.442695, %v1012_v6  ;;  %v1071_v3 = vsel %vm991_vm5, %v929_v50, %v2313_v7  ;;  %v211_v7 = vld [vmem:[#allocation2 + $0x188] sm:$0xff] }
 0x2d4   : > { %v1035_v31 = vmul.f32 1.442695, %v1011_v45  ;;  %2663 = vmatprep.mubr.f32.mxu0 %v1071_v3  ;;  %v212_v45 = vld [vmem:[#allocation2 + $0x190] sm:$0xff]  ;;  %v213_v3 = vld [vmem:[#allocation2 + $0x198] sm:$0xff] }
 0x2d5   : > { %3209 = vpow2.f32 %v1037_v58  ;;  %2664 = vmatmul.mubr.f32.gmra.mrb[20].mxu0 %v1072_v18  ;;  %v2955_v58 = vpack.c.bf16 %v212_v45, %v211_v7  ;;  %v215_v18 = vld [vmem:[#allocation2 + $0x1a8] sm:$0xff]  ;;  %v1252_v45 = vsub.s32 5, %v3552_v21 }
 0x2d6   : > { %3211 = vpow2.f32 %v1035_v31  ;;  %v2618_v53 = vpop.f32.mrb[10].mxu1  ;;  %v214_v31 = vld [vmem:[#allocation2 + $0x1a0] sm:$0xff] }
 0x2d7   : > { %v3206_v9 = vpop.eup %3205  ;;  %v964_v8 = vadd.f32 %v2618_v53, %v3837_v24  ;;  %v958_v59 = vpop.f32.mrb[11].mxu1  ;;  %2956 = vmatprep.subr.bf16.mxu1 %v2955_v58  ;;  %v2959_v53 = vpack.c.bf16 %v214_v31, %v213_v3 }
 0x2d8   : > { %v3208_v15 = vpop.eup %3207  ;;  %v959_v41 = vadd.f32 %v958_v59, %v3837_v24  ;;  %v2316_v10 = vadd.f32 -1.0, %v3206_v9  ;;  %2958 = vmatpush3.bf16.msra.mxu1 %v2955_v58  ;;  %v216_v9 = vld [vmem:[#allocation2 + $0x1b0] sm:$0xff]  ;;  %v217_v59 = vld [vmem:[#allocation2 + $0x1b8] sm:$0xff]  ;;  %v3895_v58 = vrot.slane %v3834_v44, %v1252_v45 }
 0x2d9   : > { %v1014_v16 = vmin.f32 %v964_v8, 0.0  ;;  %v2315_v34 = vadd.f32 -1.0, %v3208_v15  ;;  %vm998_vm12 = vcmp.gt.f32.partialorder %v964_v8, 0.0  ;;  %v218_v15 = vld [vmem:[#allocation2 + $0x1c0] sm:$0xff]  ;;  %2960 = vmatprep.subr.bf16.mxu0 %v2959_v53 }
 0x2da   : > { %v1013_v0 = vmin.f32 %v959_v41, 0.0  ;;  %v1074_v13 = vsel %vm994_vm8, %v944_v52, %v2316_v10  ;;  %vm997_vm11 = vcmp.gt.f32.partialorder %v959_v41, 0.0  ;;  %2962 = vmatpush3.bf16.msra.mxu0 %v2959_v53  ;;  %v1085_v10 = vsub.s32 4, %v3552_v21 }
 0x2db   : > { %v1041_v49 = vmul.f32 1.442695, %v1014_v16  ;;  %v1073_v5 = vsel %vm993_vm7, %v939_v43, %v2315_v34  ;;  %v3857_v16 = vand.u32 127, %v261_v20 }
 0x2dc   : > { %v1039_v29 = vmul.f32 1.442695, %v1013_v0  ;;  %2666 = vmatprep.mubr.f32.mxu0 %v1073_v5  ;;  %v1086_v34 = vrot.slane %v3834_v44, %v1085_v10 }
 0x2dd   : > { %3213 = vpow2.f32 %v1041_v49  ;;  %2667 = vmatmul.mubr.f32.gmra.mrb[22].mxu0 %v1074_v13  ;;  %vm263_vm1 = vcmp.lt.s32.totalorder %v3857_v16, 32  ;;  %v255_v16 = vld [vmem:[#allocation2 + $0x2e8] sm:$0xff] }
 0x2de   : > { %3215 = vpow2.f32 %v1039_v29  ;;  %v2621_v27 = vpop.f32.mrb[12].mxu1 }
 0x2df   : > { %v3210_v32 = vpop.eup %3209  ;;  %v974_v11 = vadd.f32 %v2621_v27, %v3837_v24  ;;  %v968_v17 = vpop.f32.mrb[13].mxu1 }
 0x2e0   : > { %v3212_v35 = vpop.eup %3211  ;;  %v969_v26 = vadd.f32 %v968_v17, %v3837_v24  ;;  %v2318_v63 = vadd.f32 -1.0, %v3210_v32 }
 0x2e1   : > { %v1016_v50 = vmin.f32 %v974_v11, 0.0  ;;  %v2317_v25 = vadd.f32 -1.0, %v3212_v35  ;;  %vm1000_vm14 = vcmp.gt.f32.partialorder %v974_v11, 0.0 }
 0x2e2   : > { %v1015_v28 = vmin.f32 %v969_v26, 0.0  ;;  %v1076_v48 = vsel %vm996_vm10, %v954_v23, %v2318_v63  ;;  %vm999_vm13 = vcmp.gt.f32.partialorder %v969_v26, 0.0 }
 0x2e3   : > { %v1045_v37 = vmul.f32 1.442695, %v1016_v50  ;;  %v1075_v38 = vsel %vm995_vm9, %v949_v1, %v2317_v25 }
 0x2e4   : > { %v1043_v47 = vmul.f32 1.442695, %v1015_v28  ;;  %2669 = vmatprep.mubr.f32.mxu0 %v1075_v38 }
 0x2e5   : > { %3217 = vpow2.f32 %v1045_v37  ;;  %2670 = vmatmul.mubr.f32.gmra.mrb[24].mxu0 %v1076_v48 }
 0x2e6   : > { %3219 = vpow2.f32 %v1043_v47  ;;  %v2624_v14 = vpop.f32.mrb[14].mxu1 }
 0x2e7   : > { %v3214_v39 = vpop.eup %3213  ;;  %v984_v61 = vadd.f32 %v2624_v14, %v3837_v24  ;;  %v978_v12 = vpop.f32.mrb[15].mxu1 }
 0x2e8   : > { %v3216_v30 = vpop.eup %3215  ;;  %v979_v52 = vadd.f32 %v978_v12, %v3837_v24  ;;  %v2320_v40 = vadd.f32 -1.0, %v3214_v39 }
 0x2e9   : > { %v1018_v42 = vmin.f32 %v984_v61, 0.0  ;;  %v2319_v43 = vadd.f32 -1.0, %v3216_v30  ;;  %vm1002_vm0 = vcmp.gt.f32.partialorder %v984_v61, 0.0 }
 0x2ea   : > { %v1017_v46 = vmin.f32 %v979_v52, 0.0  ;;  %v1078_v57 = vsel %vm998_vm12, %v964_v8, %v2320_v40  ;;  %vm1001_vm15 = vcmp.gt.f32.partialorder %v979_v52, 0.0  ;;  %v2963_v8 = vpack.c.bf16 %v216_v9, %v215_v18 }
 0x2eb   : > { %v1049_v36 = vmul.f32 1.442695, %v1018_v42  ;;  %v1077_v55 = vsel %vm997_vm11, %v959_v41, %v2319_v43  ;;  %v2967_v41 = vpack.c.bf16 %v218_v15, %v217_v59 }
 0x2ec   : > { %v1047_v54 = vmul.f32 1.442695, %v1017_v46  ;;  %2672 = vmatprep.mubr.f32.mxu0 %v1077_v55  ;;  %2964 = vmatprep.subr.bf16.mxu0 %v2963_v8 }
 0x2ed   : > { %3221 = vpow2.f32 %v1049_v36  ;;  %2673 = vmatmul.mubr.f32.gmra.mrb[26].mxu0 %v1078_v57  ;;  %v220_v57 = vld [vmem:[#allocation2 + $0x1d0] sm:$0xff] }
 0x2ee   : > { %3223 = vpow2.f32 %v1047_v54  ;;  %2966 = vmatpush3.bf16.msra.mxu0 %v2963_v8  ;;  %v219_v54 = vld [vmem:[#allocation2 + $0x1c8] sm:$0xff] }
 0x2ef   : > { %v3218_v51 = vpop.eup %3217  ;;  %2968 = vmatprep.subr.bf16.mxu0 %v2967_v41 }
 0x2f0   : > { %v3220_v4 = vpop.eup %3219  ;;  %v2322_v19 = vadd.f32 -1.0, %v3218_v51  ;;  %v2971_v51 = vpack.c.bf16 %v220_v57, %v219_v54 }
 0x2f1   : > { %v2321_v56 = vadd.f32 -1.0, %v3220_v4  ;;  %v221_v4 = vld [vmem:[#allocation2 + $0x1d8] sm:$0xff] }
 0x2f2   : > { %v1080_v33 = vsel %vm1000_vm14, %v974_v11, %v2322_v19  ;;  %2970 = vmatpush3.bf16.msra.mxu0 %v2967_v41  ;;  %v222_v19 = vld [vmem:[#allocation2 + $0x1e0] sm:$0xff] }
 0x2f3   : > { %v1079_v24 = vsel %vm999_vm13, %v969_v26, %v2321_v56  ;;  %2972 = vmatprep.subr.bf16.mxu0 %v2971_v51  ;;  %v2975_v56 = vpack.c.bf16 %v222_v19, %v221_v4 }
 0x2f4   : > { %2675 = vmatprep.mubr.f32.mxu0 %v1079_v24  ;;  %v223_v24 = vld [vmem:[#allocation2 + $0x1e8] sm:$0xff] }
 0x2f5   : > { %2676 = vmatmul.mubr.f32.gmra.mrb[28].mxu0 %v1080_v33  ;;  %v224_v33 = vld [vmem:[#allocation2 + $0x1f0] sm:$0xff] }
 0x2f6   : > { %2974 = vmatpush3.bf16.msra.mxu0 %v2971_v51 }
 0x2f7   : > { %v3222_v23 = vpop.eup %3221  ;;  %2976 = vmatprep.subr.bf16.mxu0 %v2975_v56 }
 0x2f8   : > { %v3224_v60 = vpop.eup %3223  ;;  %v2324_v62 = vadd.f32 -1.0, %v3222_v23  ;;  %v2979_v23 = vpack.c.bf16 %v224_v33, %v223_v24 }
 0x2f9   : > { %v2323_v1 = vadd.f32 -1.0, %v3224_v60  ;;  %v225_v60 = vld [vmem:[#allocation2 + $0x1f8] sm:$0xff] }
 0x2fa   : > { %v1082_v6 = vsel %vm1002_vm0, %v984_v61, %v2324_v62  ;;  %2978 = vmatpush3.bf16.msra.mxu0 %v2975_v56  ;;  %v226_v62 = vld [vmem:[#allocation2 + $0x200] sm:$0xff] }
 0x2fb   : > { %v1081_v2 = vsel %vm1001_vm15, %v979_v52, %v2323_v1  ;;  %2980 = vmatprep.subr.bf16.mxu0 %v2979_v23  ;;  %v2983_v1 = vpack.c.bf16 %v226_v62, %v225_v60 }
 0x2fc   : > { %2678 = vmatprep.mubr.f32.mxu0 %v1081_v2  ;;  %v227_v2 = vld [vmem:[#allocation2 + $0x208] sm:$0xff] }
 0x2fd   : > { %2679 = vmatmul.mubr.f32.gmra.mrb[30].mxu0 %v1082_v6  ;;  %v228_v6 = vld [vmem:[#allocation2 + $0x210] sm:$0xff] }
 0x2fe   : > { %2982 = vmatpush3.bf16.msra.mxu0 %v2979_v23  ;;  %v2987_v7 = vpack.c.bf16 %v228_v6, %v227_v2 }
 0x2ff   : > { %2984 = vmatprep.subr.bf16.mxu0 %v2983_v1 }
 0x302   : > { %2986 = vmatpush3.bf16.msra.mxu0 %v2983_v1 }
 0x303   : > { %2988 = vmatprep.subr.bf16.mxu0 %v2987_v7 }
 0x306   : > { %2990 = vmatpush3.bf16.msra.mxu0 %v2987_v7 }
 0x399   : > { %v2659_v0 = vpop.f32.mrb[16].mxu0 }
 0x39a   : > { %v1153_v49 = vpop.f32.mrb[17].mxu0  ;;  %v1159_v29 = vadd.f32 %v2659_v0, %v1086_v34 }
 0x39b   : > { %v1154_v5 = vadd.f32 %v1153_v49, %v1086_v34 }
 0x39d   : > { %2713 = vmatprep.mubr.msk.f32.mxu1 %vm263_vm1, %v1154_v5 }
 0x39e   : > { %2714 = vmatmul.mubr.msk.f32.vlgmr.msra.gmra.mrb[16].mxu1 %vm263_vm1, %v1159_v29 }
 0x3a0   : > { %v2662_v13 = vpop.f32.mrb[18].mxu0 }
 0x3a1   : > { %v1163_v27 = vpop.f32.mrb[19].mxu0  ;;  %v1169_v11 = vadd.f32 %v2662_v13, %v1086_v34 }
 0x3a2   : > { %v1164_v32 = vadd.f32 %v1163_v27, %v1086_v34 }
 0x3a4   : > { %2716 = vmatprep.mubr.msk.f32.mxu1 %vm263_vm1, %v1164_v32 }
 0x3a5   : > { %2717 = vmatmul.mubr.msk.f32.gmra.mrb[18].mxu1 %vm263_vm1, %v1169_v11 }
 0x3a8   : > { %v2665_v20 = vpop.f32.mrb[20].mxu0 }
 0x3a9   : > { %v1173_v17 = vpop.f32.mrb[21].mxu0  ;;  %v1179_v26 = vadd.f32 %v2665_v20, %v1086_v34 }
 0x3aa   : > { %v1174_v35 = vadd.f32 %v1173_v17, %v1086_v34 }
 0x3ac   : > { %2719 = vmatprep.mubr.msk.f32.mxu1 %vm263_vm1, %v1174_v35 }
 0x3ad   : > { %2720 = vmatmul.mubr.msk.f32.gmra.mrb[20].mxu1 %vm263_vm1, %v1179_v26 }
 0x3b0   : > { %v2668_v63 = vpop.f32.mrb[22].mxu0 }
 0x3b1   : > { %v1183_v50 = vpop.f32.mrb[23].mxu0  ;;  %v1189_v28 = vadd.f32 %v2668_v63, %v1086_v34 }
 0x3b2   : > { %v1184_v25 = vadd.f32 %v1183_v50, %v1086_v34 }
 0x3b4   : > { %2722 = vmatprep.mubr.msk.f32.mxu1 %vm263_vm1, %v1184_v25 }
 0x3b5   : > { %2723 = vmatmul.mubr.msk.f32.gmra.mrb[22].mxu1 %vm263_vm1, %v1189_v28 }
 0x3b8   : > { %v2671_v37 = vpop.f32.mrb[24].mxu0 }
 0x3b9   : > { %v1193_v38 = vpop.f32.mrb[25].mxu0  ;;  %v1199_v48 = vadd.f32 %v2671_v37, %v1086_v34 }
 0x3ba   : > { %v1194_v47 = vadd.f32 %v1193_v38, %v1086_v34 }
 0x3bc   : > { %2725 = vmatprep.mubr.msk.f32.mxu1 %vm263_vm1, %v1194_v47 }
 0x3bd   : > { %2726 = vmatmul.mubr.msk.f32.gmra.mrb[24].mxu1 %vm263_vm1, %v1199_v48 }
 0x3c0   : > { %v2674_v14 = vpop.f32.mrb[26].mxu0 }
 0x3c1   : > { %v1203_v39 = vpop.f32.mrb[27].mxu0  ;;  %v1209_v12 = vadd.f32 %v2674_v14, %v1086_v34 }
 0x3c2   : > { %v1204_v61 = vadd.f32 %v1203_v39, %v1086_v34 }
 0x3c4   : > { %2728 = vmatprep.mubr.msk.f32.mxu1 %vm263_vm1, %v1204_v61 }
 0x3c5   : > { %2729 = vmatmul.mubr.msk.f32.gmra.mrb[26].mxu1 %vm263_vm1, %v1209_v12 }
 0x3c8   : > { %v2677_v30 = vpop.f32.mrb[28].mxu0 }
 0x3c9   : > { %v1213_v52 = vpop.f32.mrb[29].mxu0  ;;  %v1219_v42 = vadd.f32 %v2677_v30, %v1086_v34 }
 0x3ca   : > { %v1214_v40 = vadd.f32 %v1213_v52, %v1086_v34 }
 0x3cc   : > { %2731 = vmatprep.mubr.msk.f32.mxu1 %vm263_vm1, %v1214_v40 }
 0x3cd   : > { %2732 = vmatmul.mubr.msk.f32.gmra.mrb[28].mxu1 %vm263_vm1, %v1219_v42 }
 0x3d0   : > { %v2680_v43 = vpop.f32.mrb[30].mxu0 }
 0x3d1   : > { %v1223_v46 = vpop.f32.mrb[31].mxu0  ;;  %v1229_v55 = vadd.f32 %v2680_v43, %v1086_v34 }
 0x3d2   : > { %v1224_v36 = vadd.f32 %v1223_v46, %v1086_v34 }
 0x3d4   : > { %2734 = vmatprep.mubr.msk.f32.mxu1 %vm263_vm1, %v1224_v36 }
 0x3d5   : > { %2735 = vmatmul.mubr.msk.f32.gmra.mrb[30].mxu1 %vm263_vm1, %v1229_v55 }
 0x471   : > { %v2715_v3 = vpop.f32.mrb[16].mxu1 }
 0x472   : > { %v1326_v31 = vadd.f32 %v2715_v3, %v3895_v58  ;;  %v1320_v18 = vpop.f32.mrb[17].mxu1 }
 0x473   : > { %v1321_v53 = vadd.f32 %v1320_v18, %v3895_v58 }
 0x474   : > { %v1416_v9 = vmin.f32 %v1326_v31, 0.0  ;;  %vm1400_vm3 = vcmp.gt.f32.partialorder %v1326_v31, 0.0 }
 0x475   : > { %v1415_v8 = vmin.f32 %v1321_v53, 0.0  ;;  %vm1399_vm2 = vcmp.gt.f32.partialorder %v1321_v53, 0.0 }
 0x476   : > { %v1433_v59 = vmul.f32 1.442695, %v1416_v9 }
 0x477   : > { %v1431_v15 = vmul.f32 1.442695, %v1415_v8 }
 0x478   : > { %3225 = vpow2.f32 %v1433_v59  ;;  %v2718_v41 = vpop.f32.mrb[18].mxu1 }
 0x479   : > { %3227 = vpow2.f32 %v1431_v15  ;;  %v1336_v10 = vadd.f32 %v2718_v41, %v3895_v58  ;;  %v1330_v34 = vpop.f32.mrb[19].mxu1 }
 0x47a   : > { %v1331_v0 = vadd.f32 %v1330_v34, %v3895_v58 }
 0x47b   : > { %v1418_v49 = vmin.f32 %v1336_v10, 0.0  ;;  %vm1402_vm5 = vcmp.gt.f32.partialorder %v1336_v10, 0.0 }
 0x47c   : > { %v1417_v5 = vmin.f32 %v1331_v0, 0.0  ;;  %vm1401_vm4 = vcmp.gt.f32.partialorder %v1331_v0, 0.0 }
 0x47d   : > { %v1437_v29 = vmul.f32 1.442695, %v1418_v49 }
 0x47e   : > { %v1435_v13 = vmul.f32 1.442695, %v1417_v5 }
 0x47f   : > { %3229 = vpow2.f32 %v1437_v29 }
 0x480   : > { %3231 = vpow2.f32 %v1435_v13  ;;  %v2721_v27 = vpop.f32.mrb[20].mxu1 }
 0x481   : > { %v1346_v32 = vadd.f32 %v2721_v27, %v3895_v58  ;;  %v1340_v11 = vpop.f32.mrb[21].mxu1 }
 0x482   : > { %v3226_v20 = vpop.eup %3225  ;;  %v1341_v17 = vadd.f32 %v1340_v11, %v3895_v58 }
 0x483   : > { %v3228_v35 = vpop.eup %3227  ;;  %v2342_v26 = vadd.f32 -1.0, %v3226_v20  ;;  %v1420_v63 = vmin.f32 %v1346_v32, 0.0  ;;  %vm1404_vm7 = vcmp.gt.f32.partialorder %v1346_v32, 0.0 }
 0x484   : > { %v1419_v50 = vmin.f32 %v1341_v17, 0.0  ;;  %v2341_v25 = vadd.f32 -1.0, %v3228_v35  ;;  %vm1403_vm6 = vcmp.gt.f32.partialorder %v1341_v17, 0.0 }
 0x485   : > { %v1441_v28 = vmul.f32 1.442695, %v1420_v63  ;;  %v1480_v47 = vsel %vm1400_vm3, %v1326_v31, %v2342_v26  ;;  %vm1644_vm3 = vcmask 269568  }
 0x486   : > { %v1439_v37 = vmul.f32 1.442695, %v1419_v50  ;;  %v1479_v38 = vsel %vm1399_vm2, %v1321_v53, %v2341_v25 }
 0x487   : > { %3233 = vpow2.f32 %v1441_v28  ;;  %2769 = vmatprep.mubr.f32.mxu0 %v1479_v38 }
 0x488   : > { %3235 = vpow2.f32 %v1439_v37  ;;  %v2724_v48 = vpop.f32.mrb[22].mxu1  ;;  %2770 = vmatmul.mubr.f32.vlgmr.msra.gmra.mrb[32].mxu0 %v1480_v47 }
 0x489   : > { %v3230_v14 = vpop.eup %3229  ;;  %v1356_v39 = vadd.f32 %v2724_v48, %v3895_v58  ;;  %v1350_v61 = vpop.f32.mrb[23].mxu1 }
 0x48a   : > { %v3232_v12 = vpop.eup %3231  ;;  %v1351_v30 = vadd.f32 %v1350_v61, %v3895_v58  ;;  %v2344_v52 = vadd.f32 -1.0, %v3230_v14 }
 0x48b   : > { %v1422_v40 = vmin.f32 %v1356_v39, 0.0  ;;  %v2343_v42 = vadd.f32 -1.0, %v3232_v12  ;;  %vm1406_vm9 = vcmp.gt.f32.partialorder %v1356_v39, 0.0 }
 0x48c   : > { %v1421_v43 = vmin.f32 %v1351_v30, 0.0  ;;  %v1482_v54 = vsel %vm1402_vm5, %v1336_v10, %v2344_v52  ;;  %vm1405_vm8 = vcmp.gt.f32.partialorder %v1351_v30, 0.0  ;;  %vm2021_vm5 = vcmask 1041409  }
 0x48d   : > { %v1445_v46 = vmul.f32 1.442695, %v1422_v40  ;;  %v1481_v36 = vsel %vm1401_vm4, %v1331_v0, %v2343_v42  ;;  %vm3412_vm4 = vmmov 0  }
 0x48e   : > { %v1443_v55 = vmul.f32 1.442695, %v1421_v43  ;;  %2772 = vmatprep.mubr.f32.mxu0 %v1481_v36 }
 0x48f   : > { %3237 = vpow2.f32 %v1445_v46  ;;  %2773 = vmatmul.mubr.f32.gmra.mrb[34].mxu0 %v1482_v54 }
 0x490   : > { %3239 = vpow2.f32 %v1443_v55  ;;  %v2727_v57 = vpop.f32.mrb[24].mxu1 }
 0x491   : > { %v3234_v51 = vpop.eup %3233  ;;  %v1366_v4 = vadd.f32 %v2727_v57, %v3895_v58  ;;  %v1360_v19 = vpop.f32.mrb[25].mxu1 }
 0x492   : > { %v3236_v56 = vpop.eup %3235  ;;  %v1361_v24 = vadd.f32 %v1360_v19, %v3895_v58  ;;  %v2346_v33 = vadd.f32 -1.0, %v3234_v51 }
 0x493   : > { %v1424_v23 = vmin.f32 %v1366_v4, 0.0  ;;  %v2345_v60 = vadd.f32 -1.0, %v3236_v56  ;;  %vm1408_vm11 = vcmp.gt.f32.partialorder %v1366_v4, 0.0 }
 0x494   : > { %v1423_v62 = vmin.f32 %v1361_v24, 0.0  ;;  %v1484_v7 = vsel %vm1404_vm7, %v1346_v32, %v2346_v33  ;;  %vm1407_vm10 = vcmp.gt.f32.partialorder %v1361_v24, 0.0  ;;  %vm2025_vm7 = vcmask 1043459  }
 0x495   : > { %v1449_v1 = vmul.f32 1.442695, %v1424_v23  ;;  %v1483_v2 = vsel %vm1403_vm6, %v1341_v17, %v2345_v60  ;;  %v3410_v60 = vmov 32   ;;  %vm2023_vm6 = vcmask 1042434  }
 0x496   : > { %v1447_v6 = vmul.f32 1.442695, %v1423_v62  ;;  %2775 = vmatprep.mubr.f32.mxu0 %v1483_v2  ;;  %3096 = vset.pattern.permute.xlu1 %v3410_v60  ;;  %v1497_v62 = vsub.s32 6, %v3552_v21 }
 0x497   : > { %3241 = vpow2.f32 %v1449_v1  ;;  %2776 = vmatmul.mubr.f32.gmra.mrb[36].mxu0 %v1484_v7  ;;  %3095 = vset.pattern.permute.xlu0 %v3410_v60 }
 0x498   : > { %3243 = vpow2.f32 %v1447_v6  ;;  %v2730_v45 = vpop.f32.mrb[26].mxu1  ;;  %v3915_v1 = vrot.slane %v3834_v44, %v1497_v62 }
 0x499   : > { %v3238_v3 = vpop.eup %3237  ;;  %v1376_v31 = vadd.f32 %v2730_v45, %v3895_v58  ;;  %v1370_v18 = vpop.f32.mrb[27].mxu1 }
 0x49a   : > { %v3240_v53 = vpop.eup %3239  ;;  %v1371_v9 = vadd.f32 %v1370_v18, %v3895_v58  ;;  %v2348_v8 = vadd.f32 -1.0, %v3238_v3 }
 0x49b   : > { %v1426_v59 = vmin.f32 %v1376_v31, 0.0  ;;  %v2347_v15 = vadd.f32 -1.0, %v3240_v53  ;;  %vm1410_vm13 = vcmp.gt.f32.partialorder %v1376_v31, 0.0 }
 0x49c   : > { %v1425_v41 = vmin.f32 %v1371_v9, 0.0  ;;  %v1486_v49 = vsel %vm1406_vm9, %v1356_v39, %v2348_v8  ;;  %vm1409_vm12 = vcmp.gt.f32.partialorder %v1371_v9, 0.0  ;;  %vm2029_vm9 = vcmask 1045509  }
 0x49d   : > { %v1453_v10 = vmul.f32 1.442695, %v1426_v59  ;;  %v1485_v34 = vsel %vm1405_vm8, %v1351_v30, %v2347_v15  ;;  %vm2027_vm8 = vcmask 1044484  }
 0x49e   : > { %v1451_v0 = vmul.f32 1.442695, %v1425_v41  ;;  %2778 = vmatprep.mubr.f32.mxu0 %v1485_v34 }
 0x49f   : > { %3245 = vpow2.f32 %v1453_v10  ;;  %2779 = vmatmul.mubr.f32.gmra.mrb[38].mxu0 %v1486_v49 }
 0x4a0   : > { %3247 = vpow2.f32 %v1451_v0  ;;  %v2733_v5 = vpop.f32.mrb[28].mxu1 }
 0x4a1   : > { %v3242_v29 = vpop.eup %3241  ;;  %v1386_v13 = vadd.f32 %v2733_v5, %v3895_v58  ;;  %v1380_v27 = vpop.f32.mrb[29].mxu1 }
 0x4a2   : > { %v3244_v32 = vpop.eup %3243  ;;  %v1381_v11 = vadd.f32 %v1380_v27, %v3895_v58  ;;  %v2350_v20 = vadd.f32 -1.0, %v3242_v29 }
 0x4a3   : > { %v1428_v17 = vmin.f32 %v1386_v13, 0.0  ;;  %v2349_v35 = vadd.f32 -1.0, %v3244_v32  ;;  %vm1412_vm15 = vcmp.gt.f32.partialorder %v1386_v13, 0.0 }
 0x4a4   : > { %v1427_v26 = vmin.f32 %v1381_v11, 0.0  ;;  %v1488_v28 = vsel %vm1408_vm11, %v1366_v4, %v2350_v20  ;;  %vm1411_vm14 = vcmp.gt.f32.partialorder %v1381_v11, 0.0  ;;  %vm2033_vm11 = vcmask 1047559  }
 0x4a5   : > { %v1457_v63 = vmul.f32 1.442695, %v1428_v17  ;;  %v1487_v50 = vsel %vm1407_vm10, %v1361_v24, %v2349_v35  ;;  %vm2031_vm10 = vcmask 1046534  }
 0x4a6   : > { %v1455_v25 = vmul.f32 1.442695, %v1427_v26  ;;  %2781 = vmatprep.mubr.f32.mxu0 %v1487_v50 }
 0x4a7   : > { %3249 = vpow2.f32 %v1457_v63  ;;  %2782 = vmatmul.mubr.f32.gmra.mrb[40].mxu0 %v1488_v28 }
 0x4a8   : > { %3251 = vpow2.f32 %v1455_v25  ;;  %v2736_v37 = vpop.f32.mrb[30].mxu1 }
 0x4a9   : > { %v3246_v38 = vpop.eup %3245  ;;  %v1396_v47 = vadd.f32 %v2736_v37, %v3895_v58  ;;  %v1390_v48 = vpop.f32.mrb[31].mxu1 }
 0x4aa   : > { %v3248_v14 = vpop.eup %3247  ;;  %v1391_v39 = vadd.f32 %v1390_v48, %v3895_v58  ;;  %v2352_v61 = vadd.f32 -1.0, %v3246_v38 }
 0x4ab   : > { %v1430_v12 = vmin.f32 %v1396_v47, 0.0  ;;  %v2351_v30 = vadd.f32 -1.0, %v3248_v14  ;;  %vm1414_vm2 = vcmp.gt.f32.partialorder %v1396_v47, 0.0 }
 0x4ac   : > { %v1429_v52 = vmin.f32 %v1391_v39, 0.0  ;;  %v1490_v46 = vsel %vm1410_vm13, %v1376_v31, %v2352_v61  ;;  %vm1413_vm0 = vcmp.gt.f32.partialorder %v1391_v39, 0.0 }
 0x4ad   : > { %v1461_v40 = vmul.f32 1.442695, %v1430_v12  ;;  %v1489_v42 = vsel %vm1409_vm12, %v1371_v9, %v2351_v30 }
 0x4ae   : > { %v1459_v43 = vmul.f32 1.442695, %v1429_v52  ;;  %2784 = vmatprep.mubr.f32.mxu0 %v1489_v42 }
 0x4af   : > { %3253 = vpow2.f32 %v1461_v40  ;;  %2785 = vmatmul.mubr.f32.gmra.mrb[42].mxu0 %v1490_v46 }
 0x4b0   : > { %3255 = vpow2.f32 %v1459_v43 }
 0x4b1   : > { %v3250_v36 = vpop.eup %3249 }
 0x4b2   : > { %v3252_v55 = vpop.eup %3251  ;;  %v2354_v54 = vadd.f32 -1.0, %v3250_v36 }
 0x4b3   : > { %v2353_v57 = vadd.f32 -1.0, %v3252_v55 }
 0x4b4   : > { %v1492_v51 = vsel %vm1412_vm15, %v1386_v13, %v2354_v54 }
 0x4b5   : > { %v1491_v58 = vsel %vm1411_vm14, %v1381_v11, %v2353_v57 }
 0x4b6   : > { %2787 = vmatprep.mubr.f32.mxu0 %v1491_v58 }
 0x4b7   : > { %2788 = vmatmul.mubr.f32.gmra.mrb[44].mxu0 %v1492_v51 }
 0x4b9   : > { %v3254_v4 = vpop.eup %3253 }
 0x4ba   : > { %v3256_v19 = vpop.eup %3255  ;;  %v2356_v56 = vadd.f32 -1.0, %v3254_v4 }
 0x4bb   : > { %v2355_v24 = vadd.f32 -1.0, %v3256_v19 }
 0x4bc   : > { %v1494_v23 = vsel %vm1414_vm2, %v1396_v47, %v2356_v56 }
 0x4bd   : > { %v1493_v33 = vsel %vm1413_vm0, %v1391_v39, %v2355_v24 }
 0x4be   : > { %2790 = vmatprep.mubr.f32.mxu0 %v1493_v33 }
 0x4bf   : > { %2791 = vmatmul.mubr.f32.gmra.mrb[46].mxu0 %v1494_v23 }
 0x55b   : > { %v2771_v2 = vpop.f32.mrb[32].mxu0 }
 0x55c   : > { %v3918_v6 = vadd.f32 %v2771_v2, %v3915_v1  ;;  %v1565_v7 = vpop.f32.mrb[33].mxu0 }
 0x55d   : > { %v3921_v45 = vadd.f32 %v1565_v7, %v3915_v1 }
 0x55e   : > { %v1646_v3 = vsel %vm1644_vm3, %v3918_v6, -inf }
 0x55f   : > { %v1645_v31 = vsel %vm1644_vm3, %v3921_v45, -inf }
 0x560   : > { %v1647_v18 = vmax.f32 %v1645_v31, %v1646_v3 }
 0x562   : > { %v1648_v53 = vrot.slane %v1647_v18, 4  ;;  %v2774_v9 = vpop.f32.mrb[34].mxu0 }
 0x563   : > { %v3928_v44 = vadd.f32 %v2774_v9, %v3915_v1  ;;  %v1575_v8 = vpop.f32.mrb[35].mxu0 }
 0x564   : > { %v1649_v59 = vmax.f32 %v1647_v18, %v1648_v53  ;;  %v3931_v15 = vadd.f32 %v1575_v8, %v3915_v1 }
 0x565   : > { %v1655_v41 = vsel %vm1644_vm3, %v3928_v44, -inf }
 0x566   : > { %v1650_v10 = vrot.slane %v1649_v59, 2  ;;  %v1654_v34 = vsel %vm1644_vm3, %v3931_v15, -inf }
 0x567   : > { %v1656_v0 = vmax.f32 %v1654_v34, %v1655_v41 }
 0x568   : > { %v1651_v49 = vmax.f32 %v1649_v59, %v1650_v10 }
 0x569   : > { %v1657_v5 = vrot.slane %v1656_v0, 4 }
 0x56a   : > { %v1652_v29 = vrot.slane %v1651_v49, 1  ;;  %v2777_v13 = vpop.f32.mrb[36].mxu0 }
 0x56b   : > { %v1658_v27 = vmax.f32 %v1656_v0, %v1657_v5  ;;  %v3938_v32 = vadd.f32 %v2777_v13, %v3915_v1  ;;  %v1585_v11 = vpop.f32.mrb[37].mxu0 }
 0x56c   : > { %v1653_v20 = vmax.f32 %v1651_v49, %v1652_v29  ;;  %v3941_v17 = vadd.f32 %v1585_v11, %v3915_v1 }
 0x56d   : > { %v1659_v35 = vrot.slane %v1658_v27, 2  ;;  %v1664_v26 = vsel %vm1644_vm3, %v3938_v32, -inf }
 0x56e   : > { %v1717_v63 = vsub.f32 %v3921_v45, %v1653_v20  ;;  %v1718_v50 = vsub.f32 %v3918_v6, %v1653_v20  ;;  %v1663_v25 = vsel %vm1644_vm3, %v3941_v17, -inf }
 0x56f   : > { %v1660_v28 = vmax.f32 %v1658_v27, %v1659_v35  ;;  %v1665_v37 = vmax.f32 %v1663_v25, %v1664_v26 }
 0x570   : > { %v1733_v38 = vmul.f32 1.442695, %v1717_v63  ;;  %v1735_v47 = vmul.f32 1.442695, %v1718_v50 }
 0x571   : > { %v1661_v48 = vrot.slane %v1660_v28, 1  ;;  %v1666_v14 = vrot.slane %v1665_v37, 4 }
 0x572   : > { %3257 = vpow2.f32 %v1733_v38  ;;  %v2780_v39 = vpop.f32.mrb[38].mxu0 }
 0x573   : > { %3259 = vpow2.f32 %v1735_v47  ;;  %v1662_v61 = vmax.f32 %v1660_v28, %v1661_v48  ;;  %v1667_v12 = vmax.f32 %v1665_v37, %v1666_v14  ;;  %v3950_v30 = vadd.f32 %v2780_v39, %v3915_v1  ;;  %v1595_v52 = vpop.f32.mrb[39].mxu0 }
 0x574   : > { %v3953_v40 = vadd.f32 %v1595_v52, %v3915_v1 }
 0x575   : > { %v1719_v42 = vsub.f32 %v3931_v15, %v1662_v61  ;;  %v1720_v43 = vsub.f32 %v3928_v44, %v1662_v61  ;;  %v1668_v46 = vrot.slane %v1667_v12, 2  ;;  %v1673_v36 = vsel %vm1644_vm3, %v3950_v30, -inf }
 0x576   : > { %v1672_v55 = vsel %vm1644_vm3, %v3953_v40, -inf }
 0x577   : > { %v1737_v54 = vmul.f32 1.442695, %v1719_v42  ;;  %v1739_v57 = vmul.f32 1.442695, %v1720_v43  ;;  %v1669_v58 = vmax.f32 %v1667_v12, %v1668_v46  ;;  %v1674_v51 = vmax.f32 %v1672_v55, %v1673_v36 }
 0x579   : > { %3261 = vpow2.f32 %v1737_v54  ;;  %v1670_v4 = vrot.slane %v1669_v58, 1  ;;  %v1675_v19 = vrot.slane %v1674_v51, 4 }
 0x57a   : > { %3263 = vpow2.f32 %v1739_v57  ;;  %v2783_v56 = vpop.f32.mrb[40].mxu0 }
 0x57b   : > { %v1671_v24 = vmax.f32 %v1669_v58, %v1670_v4  ;;  %v1676_v33 = vmax.f32 %v1674_v51, %v1675_v19  ;;  %v3962_v23 = vadd.f32 %v2783_v56, %v3915_v1  ;;  %v1605_v60 = vpop.f32.mrb[41].mxu0 }
 0x57c   : > { %v3964_v62 = vpop.eup %3257  ;;  %v3967_v2 = vadd.f32 %v1605_v60, %v3915_v1 }
 0x57d   : > { %v3969_v7 = vpop.eup %3259  ;;  %v1765_v3 = vsel %vm1644_vm3, %v3964_v62, 0.0  ;;  %v1721_v31 = vsub.f32 %v3941_v17, %v1671_v24  ;;  %v1722_v18 = vsub.f32 %v3938_v32, %v1671_v24  ;;  %v1677_v53 = vrot.slane %v1676_v33, 2 }
 0x57e   : > { %v1766_v9 = vsel %vm1644_vm3, %v3969_v7, 0.0  ;;  %v1682_v8 = vsel %vm1644_vm3, %v3962_v23, -inf  ;;  %v1681_v59 = vsel %vm1644_vm3, %v3967_v2, -inf }
 0x57f   : > { %v1767_v41 = vadd.f32 %v1766_v9, %v1765_v3  ;;  %v1741_v10 = vmul.f32 1.442695, %v1721_v31  ;;  %v1743_v34 = vmul.f32 1.442695, %v1722_v18  ;;  %v1678_v0 = vmax.f32 %v1676_v33, %v1677_v53 }
 0x580   : > { %v1683_v49 = vmax.f32 %v1681_v59, %v1682_v8 }
 0x581   : > { %v1768_v5 = vrot.slane %v1767_v41, 4  ;;  %3265 = vpow2.f32 %v1741_v10  ;;  %v1679_v29 = vrot.slane %v1678_v0, 1 }
 0x582   : > { %3267 = vpow2.f32 %v1743_v34  ;;  %v1684_v13 = vrot.slane %v1683_v49, 4  ;;  %v2786_v27 = vpop.f32.mrb[42].mxu0 }
 0x583   : > { %v3981_v11 = vpop.eup %3261  ;;  %v1680_v20 = vmax.f32 %v1678_v0, %v1679_v29  ;;  %v3984_v35 = vadd.f32 %v2786_v27, %v3915_v1  ;;  %v1615_v26 = vpop.f32.mrb[43].mxu0  ;;  %v1769_v63 = vadd.f32 %v1768_v5, %v1767_v41 }
 0x584   : > { %v3986_v50 = vpop.eup %3263  ;;  %v1774_v25 = vsel %vm1644_vm3, %v3981_v11, 0.0  ;;  %v1685_v28 = vmax.f32 %v1683_v49, %v1684_v13  ;;  %v3991_v37 = vadd.f32 %v1615_v26, %v3915_v1 }
 0x585   : > { %v1775_v38 = vsel %vm1644_vm3, %v3986_v50, 0.0  ;;  %v1723_v47 = vsub.f32 %v3953_v40, %v1680_v20  ;;  %v1724_v48 = vsub.f32 %v3950_v30, %v1680_v20  ;;  %v1691_v14 = vsel %vm1644_vm3, %v3984_v35, -inf }
 0x586   : > { %v1776_v39 = vadd.f32 %v1775_v38, %v1774_v25  ;;  %v1686_v61 = vrot.slane %v1685_v28, 2  ;;  %v1690_v12 = vsel %vm1644_vm3, %v3991_v37, -inf  ;;  %v1770_v52 = vrot.slane %v1769_v63, 2 }
 0x587   : > { %v1745_v42 = vmul.f32 1.442695, %v1723_v47  ;;  %v1747_v43 = vmul.f32 1.442695, %v1724_v48  ;;  %v1692_v46 = vmax.f32 %v1690_v12, %v1691_v14 }
 0x588   : > { %v1777_v36 = vrot.slane %v1776_v39, 4  ;;  %v1687_v55 = vmax.f32 %v1685_v28, %v1686_v61  ;;  %v1771_v54 = vadd.f32 %v1770_v52, %v1769_v63 }
 0x589   : > { %3269 = vpow2.f32 %v1745_v42  ;;  %v1693_v57 = vrot.slane %v1692_v46, 4 }
 0x58a   : > { %3271 = vpow2.f32 %v1747_v43  ;;  %v1688_v58 = vrot.slane %v1687_v55, 1  ;;  %v2789_v51 = vpop.f32.mrb[44].mxu0  ;;  %v1772_v4 = vrot.slane %v1771_v54, 1  ;;  %v1778_v19 = vadd.f32 %v1777_v36, %v1776_v39 }
 0x58b   : > { %v4001_v56 = vpop.eup %3265  ;;  %v1694_v24 = vmax.f32 %v1692_v46, %v1693_v57  ;;  %v4004_v33 = vadd.f32 %v2789_v51, %v3915_v1  ;;  %v1625_v60 = vpop.f32.mrb[45].mxu0 }
 0x58c   : > { %v4006_v3 = vpop.eup %3267  ;;  %v1783_v31 = vsel %vm1644_vm3, %v4001_v56, 0.0  ;;  %v1689_v18 = vmax.f32 %v1687_v55, %v1688_v58  ;;  %v4011_v53 = vadd.f32 %v1625_v60, %v3915_v1  ;;  %v1773_v9 = vadd.f32 %v1772_v4, %v1771_v54 }
 0x58d   : > { %v1784_v8 = vsel %vm1644_vm3, %v4006_v3, 0.0  ;;  %v1695_v59 = vrot.slane %v1694_v24, 2  ;;  %v1700_v41 = vsel %vm1644_vm3, %v4004_v33, -inf  ;;  %v1779_v10 = vrot.slane %v1778_v19, 2 }
 0x58e   : > { %v1785_v34 = vadd.f32 %v1784_v8, %v1783_v31  ;;  %v1725_v0 = vsub.f32 %v3967_v2, %v1689_v18  ;;  %v1726_v49 = vsub.f32 %v3962_v23, %v1689_v18  ;;  %v1699_v5 = vsel %vm1644_vm3, %v4011_v53, -inf }
 0x58f   : > { %v1696_v29 = vmax.f32 %v1694_v24, %v1695_v59  ;;  %v1701_v13 = vmax.f32 %v1699_v5, %v1700_v41  ;;  %3273 = vrcp.f32 %v1773_v9  ;;  %v1780_v27 = vadd.f32 %v1779_v10, %v1778_v19 }
 0x590   : > { %v1786_v20 = vrot.slane %v1785_v34, 4  ;;  %v1749_v26 = vmul.f32 1.442695, %v1725_v0  ;;  %v1751_v63 = vmul.f32 1.442695, %v1726_v49 }
 0x591   : > { %v1697_v25 = vrot.slane %v1696_v29, 1  ;;  %v1702_v28 = vrot.slane %v1701_v13, 4  ;;  %v1781_v38 = vrot.slane %v1780_v27, 1 }
 0x592   : > { %3275 = vpow2.f32 %v1749_v26  ;;  %v2792_v47 = vpop.f32.mrb[46].mxu0  ;;  %v1787_v48 = vadd.f32 %v1786_v20, %v1785_v34 }
 0x593   : > { %v4021_v14 = vpop.eup %3269  ;;  %3277 = vpow2.f32 %v1751_v63  ;;  %v1698_v39 = vmax.f32 %v1696_v29, %v1697_v25  ;;  %v1703_v61 = vmax.f32 %v1701_v13, %v1702_v28  ;;  %v4024_v12 = vadd.f32 %v2792_v47, %v3915_v1  ;;  %v1635_v52 = vpop.f32.mrb[47].mxu0 }
 0x594   : > { %v4026_v42 = vpop.eup %3271  ;;  %v1792_v43 = vsel %vm1644_vm3, %v4021_v14, 0.0  ;;  %v4031_v46 = vadd.f32 %v1635_v52, %v3915_v1  ;;  %v1782_v36 = vadd.f32 %v1781_v38, %v1780_v27  ;;  %v1788_v55 = vrot.slane %v1787_v48, 2 }
 0x595   : > { %v1793_v54 = vsel %vm1644_vm3, %v4026_v42, 0.0  ;;  %v1727_v57 = vsub.f32 %v3991_v37, %v1698_v39  ;;  %v1728_v58 = vsub.f32 %v3984_v35, %v1698_v39  ;;  %v1704_v51 = vrot.slane %v1703_v61, 2 }
 0x596   : > { %v1794_v4 = vadd.f32 %v1793_v54, %v1792_v43  ;;  %v1709_v19 = vsel %vm1644_vm3, %v4024_v12, -inf  ;;  %v1708_v24 = vsel %vm1644_vm3, %v4031_v46, -inf  ;;  %3279 = vrcp.f32 %v1782_v36 }
 0x597   : > { %v1753_v1 = vmul.f32 1.442695, %v1727_v57  ;;  %v1755_v60 = vmul.f32 1.442695, %v1728_v58  ;;  %v1705_v31 = vmax.f32 %v1703_v61, %v1704_v51  ;;  %v1710_v18 = vmax.f32 %v1708_v24, %v1709_v19 }
 0x598   : > { %v1795_v9 = vrot.slane %v1794_v4, 4  ;;  %v1789_v8 = vadd.f32 %v1788_v55, %v1787_v48 }
 0x599   : > { %v3274_v59 = vpop.eup %3273  ;;  %3281 = vpow2.f32 %v1753_v1  ;;  %v1706_v41 = vrot.slane %v1705_v31, 1  ;;  %v1711_v10 = vrot.slane %v1710_v18, 4 }
 0x59a   : > { %3283 = vpow2.f32 %v1755_v60  ;;  %v1846_v34 = vmul.f32 %v3274_v59, %v3969_v7  ;;  %v1845_v0 = vmul.f32 %v3274_v59, %v3964_v62  ;;  %v1790_v49 = vrot.slane %v1789_v8, 1 }
 0x59b   : > { %v1707_v5 = vmax.f32 %v1705_v31, %v1706_v41  ;;  %v1712_v29 = vmax.f32 %v1710_v18, %v1711_v10  ;;  %v1796_v13 = vadd.f32 %v1795_v9, %v1794_v4 }
 0x59c   : > { %v4043_v27 = vpop.eup %3275  ;;  %1868 = vperm.xlu1 %3096, %v1846_v34   ;;  %1863 = vperm.xlu0 %3095, %v1845_v0   ;;  %v1791_v20 = vadd.f32 %v1790_v49, %v1789_v8 }
 0x59d   : > { %v4045_v26 = vpop.eup %3277  ;;  %v1801_v63 = vsel %vm1644_vm3, %v4043_v27, 0.0  ;;  %v1729_v25 = vsub.f32 %v4011_v53, %v1707_v5  ;;  %v1730_v7 = vsub.f32 %v4004_v33, %v1707_v5  ;;  %v1713_v28 = vrot.slane %v1712_v29, 2 }
 0x59e   : > { %v1802_v62 = vsel %vm1644_vm3, %v4045_v26, 0.0  ;;  %3285 = vrcp.f32 %v1791_v20  ;;  %v1797_v38 = vrot.slane %v1796_v13, 2 }
 0x59f   : > { %v1803_v47 = vadd.f32 %v1802_v62, %v1801_v63  ;;  %v1757_v48 = vmul.f32 1.442695, %v1729_v25  ;;  %v1759_v39 = vmul.f32 1.442695, %v1730_v7  ;;  %v1714_v61 = vmax.f32 %v1712_v29, %v1713_v28 }
 0x5a0   : > { %v3280_v52 = vpop.eup %3279  ;;  %v1798_v43 = vadd.f32 %v1797_v38, %v1796_v13 }
 0x5a1   : > { %v1804_v36 = vrot.slane %v1803_v47, 4  ;;  %3287 = vpow2.f32 %v1757_v48  ;;  %v1715_v55 = vrot.slane %v1714_v61, 1  ;;  %v1847_v54 = vmul.f32 %v3280_v52, %v3981_v11 }
 0x5a2   : > { %3289 = vpow2.f32 %v1759_v39  ;;  %v1799_v57 = vrot.slane %v1798_v43, 1  ;;  %v1848_v1 = vmul.f32 %v3280_v52, %v3986_v50 }
 0x5a3   : > { %v4054_v58 = vpop.eup %3281  ;;  %v1716_v51 = vmax.f32 %v1714_v61, %v1715_v55  ;;  %1873 = vperm.xlu1 %3096, %v1847_v54   ;;  %v1805_v4 = vadd.f32 %v1804_v36, %v1803_v47 }
 0x5a4   : > { %v4056_v19 = vpop.eup %3283  ;;  %v1810_v24 = vsel %vm1644_vm3, %v4054_v58, 0.0  ;;  %v1800_v60 = vadd.f32 %v1799_v57, %v1798_v43 }
 0x5a5   : > { %v1811_v31 = vsel %vm1644_vm3, %v4056_v19, 0.0  ;;  %v1731_v11 = vsub.f32 %v4031_v46, %v1716_v51  ;;  %v1732_v18 = vsub.f32 %v4024_v12, %v1716_v51  ;;  %v1806_v9 = vrot.slane %v1805_v4, 2 }
 0x5a6   : > { %v1812_v8 = vadd.f32 %v1811_v31, %v1810_v24  ;;  %3291 = vrcp.f32 %v1800_v60 }
 0x5a7   : > { %v1761_v59 = vmul.f32 1.442695, %v1731_v11  ;;  %v1763_v41 = vmul.f32 1.442695, %v1732_v18  ;;  %1878 = vperm.xlu1 %3096, %v1848_v1   ;;  %v1807_v10 = vadd.f32 %v1806_v9, %v1805_v4 }
 0x5a8   : > { %v3286_v34 = vpop.eup %3285  ;;  %v1813_v0 = vrot.slane %v1812_v8, 4 }
 0x5a9   : > { %3293 = vpow2.f32 %v1761_v59  ;;  %v1849_v50 = vmul.f32 %v3286_v34, %v4001_v56  ;;  %v1808_v49 = vrot.slane %v1807_v10, 1  ;;  %v1850_v28 = vmul.f32 %v3286_v34, %v4006_v3 }
 0x5aa   : > { %3295 = vpow2.f32 %v1763_v41  ;;  %v1814_v5 = vadd.f32 %v1813_v0, %v1812_v8 }
 0x5ab   : > { %v3288_v29 = vpop.eup %3287  ;;  %1883 = vperm.xlu1 %3096, %v1849_v50   ;;  %v1809_v13 = vadd.f32 %v1808_v49, %v1807_v10 }
 0x5ac   : > { %v3290_v20 = vpop.eup %3289  ;;  %v1819_v63 = vsel %vm1644_vm3, %v3288_v29, 0.0  ;;  %v1815_v25 = vrot.slane %v1814_v5, 2 }
 0x5ad   : > { %v1820_v7 = vsel %vm1644_vm3, %v3290_v20, 0.0  ;;  %3297 = vrcp.f32 %v1809_v13  ;;  %v229_v13 = vld [vmem:[#allocation2 + $0x218] sm:$0xff] }
 0x5ae   : > { %v1821_v62 = vadd.f32 %v1820_v7, %v1819_v63  ;;  %v1816_v38 = vadd.f32 %v1815_v25, %v1814_v5  ;;  %v230_v63 = vld [vmem:[#allocation2 + $0x220] sm:$0xff]  ;;  %v3411_v25 = vmov 0.0|0.0   ;;  %v233_v7 = vld [vmem:[#allocation2 + $0x238] sm:$0xff] }
 0x5af   : > { %1888 = vperm.xlu1 %3096, %v1850_v28   ;;  %2991 = vmatprep.subr.bf16.mxu1 %v3411_v25  ;;  %v234_v28 = vld [vmem:[#allocation2 + $0x240] sm:$0xff] }
 0x5b0   : > { %v3292_v47 = vpop.eup %3291  ;;  %v1822_v56 = vrot.slane %v1821_v62, 4  ;;  %v1817_v48 = vrot.slane %v1816_v38, 1  ;;  %3015 = vmatprep.subr.bf16.mxu0 %v3411_v25 }
 0x5b1   : > { %v1851_v39 = vmul.f32 %v3292_v47, %v4021_v14  ;;  %v1852_v57 = vmul.f32 %v3292_v47, %v4026_v42  ;;  %v236_v47 = vld [vmem:[#allocation2 + $0x250] sm:$0xff] }
 0x5b2   : > { %v1818_v61 = vadd.f32 %v1817_v48, %v1816_v38  ;;  %v1823_v52 = vadd.f32 %v1822_v56, %v1821_v62  ;;  %v2998_v62 = vpack.c.bf16 %v234_v28, %v233_v7  ;;  %v235_v38 = vld [vmem:[#allocation2 + $0x248] sm:$0xff]  ;;  %v3413_v56 = vmov 0.0  }
 0x5b3   : > { %v3294_v43 = vpop.eup %3293  ;;  %1893 = vperm.xlu1 %3096, %v1851_v39   ;;  %2825 = vmatprep.mubr.msk.f32.mxu1 %vm3412_vm4, %v3413_v56  ;;  %v3001_v48 = vpack.c.bf16 %v236_v47, %v235_v38  ;;  %v237_v39 = vld [vmem:[#allocation2 + $0x258] sm:$0xff] }
 0x5b4   : > { %v3296_v36 = vpop.eup %3295  ;;  %v1828_v55 = vsel %vm1644_vm3, %v3294_v43, 0.0  ;;  %3299 = vrcp.f32 %v1818_v61  ;;  %v1824_v54 = vrot.slane %v1823_v52, 2  ;;  %2860 = vmatprep.mubr.msk.f32.mxu0 %vm3412_vm4, %v3413_v56  ;;  %v238_v61 = vld [vmem:[#allocation2 + $0x260] sm:$0xff] }
 0x5b5   : > { %v1829_v3 = vsel %vm1644_vm3, %v3296_v36, 0.0 }
 0x5b6   : > { %v1830_v51 = vadd.f32 %v1829_v3, %v1828_v55  ;;  %v1825_v4 = vadd.f32 %v1824_v54, %v1823_v52  ;;  %v3004_v52 = vpack.c.bf16 %v238_v61, %v237_v39  ;;  %v241_v54 = vld [vmem:[#allocation2 + $0x278] sm:$0xff]  ;;  %v242_v3 = vld [vmem:[#allocation2 + $0x280] sm:$0xff] }
 0x5b7   : > { %v3298_v24 = vpop.eup %3297  ;;  %1898 = vperm.xlu1 %3096, %v1852_v57   ;;  %v3010_v57 = vpack.c.bf16 %v242_v3, %v241_v54 }
 0x5b8   : > { %v1831_v1 = vrot.slane %v1830_v51, 4  ;;  %v1853_v14 = vmul.f32 %v3298_v24, %v4043_v27  ;;  %v1854_v60 = vmul.f32 %v3298_v24, %v4045_v26  ;;  %v1826_v31 = vrot.slane %v1825_v4, 1 }
 0x5ba   : > { %1908 = vperm.xlu0 %3095, %v1854_v60   ;;  %v1827_v11 = vadd.f32 %v1826_v31, %v1825_v4  ;;  %v1832_v18 = vadd.f32 %v1831_v1, %v1830_v51  ;;  %v243_v51 = vld [vmem:[#allocation2 + $0x288] sm:$0xff]  ;;  %v244_v4 = vld [vmem:[#allocation2 + $0x290] sm:$0xff]  ;;  %v245_v1 = vld [vmem:[#allocation2 + $0x298] sm:$0xff] }
 0x5bb   : > { %1903 = vperm.xlu1 %3096, %v1853_v14   ;;  %v3013_v24 = vpack.c.bf16 %v244_v4, %v243_v51  ;;  %v246_v14 = vld [vmem:[#allocation2 + $0x2a0] sm:$0xff]  ;;  %v247_v60 = vld [vmem:[#allocation2 + $0x2a8] sm:$0xff] }
 0x5bc   : > { %3301 = vrcp.f32 %v1827_v11  ;;  %v1833_v9 = vrot.slane %v1832_v18, 2  ;;  %v3016_v31 = vpack.c.bf16 %v246_v14, %v245_v1  ;;  %v248_v11 = vld [vmem:[#allocation2 + $0x2b0] sm:$0xff] }
 0x5be   : > { %v3300_v8 = vpop.eup %3299  ;;  %v1834_v59 = vadd.f32 %v1833_v9, %v1832_v18  ;;  %3017 = vmatpush3.bf16.msra.mxu0 %v3016_v31  ;;  %v3019_v18 = vpack.c.bf16 %v248_v11, %v247_v60  ;;  %v249_v9 = vld [vmem:[#allocation2 + $0x2b8] sm:$0xff] }
 0x5bf   : > { %v1855_v42 = vmul.f32 %v3300_v8, %v4054_v58  ;;  %v1856_v41 = vmul.f32 %v3300_v8, %v4056_v19  ;;  %v2992_v58 = vpack.c.bf16 %v230_v63, %v229_v13  ;;  %v231_v19 = vld [vmem:[#allocation2 + $0x228] sm:$0xff]  ;;  %3018 = vmatprep.subr.bf16.mxu0 %v3411_v25  ;;  %v250_v8 = vld [vmem:[#allocation2 + $0x2c0] sm:$0xff] }
 0x5c0   : > { %v1835_v10 = vrot.slane %v1834_v59, 1 }
 0x5c1   : > { %1913 = vperm.xlu1 %3096, %v1855_v42   ;;  %1918 = vperm.xlu0 %3095, %v1856_v41  }
 0x5c2   : > { %v1836_v34 = vadd.f32 %v1835_v10, %v1834_v59  ;;  %2993 = vmatpush3.bf16.msra.mxu1 %v2992_v58  ;;  %3020 = vmatpush3.bf16.msra.mxu0 %v3019_v18  ;;  %v3022_v59 = vpack.c.bf16 %v250_v8, %v249_v9 }
 0x5c3   : > { %2994 = vmatprep.subr.bf16.mxu1 %v3411_v25  ;;  %3021 = vmatprep.subr.bf16.mxu0 %v3411_v25 }
 0x5c4   : > { %3303 = vrcp.f32 %v1836_v34 }
 0x5c6   : > { %v3302_v27 = vpop.eup %3301  ;;  %3023 = vmatpush3.bf16.msra.mxu0 %v3022_v59 }
 0x5c7   : > { %v1857_v26 = vmul.f32 %v3302_v27, %v3288_v29  ;;  %v1858_v0 = vmul.f32 %v3302_v27, %v3290_v20  ;;  %v232_v29 = vld [vmem:[#allocation2 + $0x230] sm:$0xff]  ;;  %3024 = vmatprep.subr.bf16.mxu0 %v3411_v25 }
 0x5c8   : > { %v2995_v20 = vpack.c.bf16 %v232_v29, %v231_v19 }
 0x5c9   : > { %1923 = vperm.xlu1 %3096, %v1857_v26   ;;  %1928 = vperm.xlu0 %3095, %v1858_v0  }
 0x5ca   : > { %2996 = vmatpush3.bf16.msra.mxu1 %v2995_v20 }
 0x5cb   : > { %2997 = vmatprep.subr.bf16.mxu1 %v3411_v25 }
 0x5ce   : > { %v3304_v50 = vpop.eup %3303  ;;  %2999 = vmatpush3.bf16.msra.mxu1 %v2998_v62 }
 0x5cf   : > { %v1860_v49 = vmul.f32 %v3304_v50, %v3296_v36  ;;  %v1859_v5 = vmul.f32 %v3304_v50, %v3294_v43  ;;  %3000 = vmatprep.subr.bf16.mxu1 %v3411_v25  ;;  %v239_v43 = vld [vmem:[#allocation2 + $0x268] sm:$0xff]  ;;  %v240_v36 = vld [vmem:[#allocation2 + $0x270] sm:$0xff] }
 0x5d0   : > { %v3007_v55 = vpack.c.bf16 %v240_v36, %v239_v43 }
 0x5d1   : > { %1938 = vperm.xlu0 %3095, %v1860_v49   ;;  %1933 = vperm.xlu1 %3096, %v1859_v5  }
 0x5d2   : > { %3002 = vmatpush3.bf16.msra.mxu1 %v3001_v48 }
 0x5d3   : > { %3003 = vmatprep.subr.bf16.mxu1 %v3411_v25 }
 0x5d6   : > { %3005 = vmatpush3.bf16.msra.mxu1 %v3004_v52 }
 0x5d7   : > { %3006 = vmatprep.subr.bf16.mxu1 %v3411_v25 }
 0x5da   : > { %3008 = vmatpush3.bf16.msra.mxu1 %v3007_v55 }
 0x5db   : > { %3009 = vmatprep.subr.bf16.mxu1 %v3411_v25 }
 0x5de   : > { %3011 = vmatpush3.bf16.msra.mxu1 %v3010_v57 }
 0x5df   : > { %3012 = vmatprep.subr.bf16.mxu1 %v3411_v25 }
 0x5e2   : > { %3014 = vmatpush3.bf16.msra.mxu1 %v3013_v24 }
 0x61b   : > { %v1869_v42 = vpop.permute.xlu1 %1868  ;;  %v1864_v50 = vpop.permute.xlu0 %1863 }
 0x61c   : > { %v1942_v63 = vmul.f32 %v1869_v42, %v3918_v6  ;;  %v1941_v58 = vmul.f32 %v1864_v50, %v3921_v45 }
 0x61e   : > { %v1957_v47 = vadd.f32 %v1942_v63, %v1941_v58 }
 0x622   : > { %v1874_v41 = vpop.permute.xlu1 %1873 }
 0x623   : > { %v1943_v29 = vmul.f32 %v1874_v41, %v3931_v15 }
 0x626   : > { %v1879_v10 = vpop.permute.xlu1 %1878 }
 0x627   : > { %v1944_v49 = vmul.f32 %v1879_v10, %v3928_v44 }
 0x629   : > { %v1964_v38 = vadd.f32 %v1944_v49, %v1943_v29 }
 0x62a   : > { %v1884_v34 = vpop.permute.xlu1 %1883 }
 0x62b   : > { %v1945_v7 = vmul.f32 %v1884_v34, %v3941_v17  ;;  %v1958_v17 = vrot.slane %v1957_v47, 4 }
 0x62d   : > { %v1959_v55 = vadd.f32 %v1958_v17, %v1957_v47 }
 0x62e   : > { %v1889_v27 = vpop.permute.xlu1 %1888 }
 0x62f   : > { %v1946_v19 = vmul.f32 %v1889_v27, %v3938_v32  ;;  %v1960_v14 = vrot.slane %v1959_v55, 2 }
 0x631   : > { %v1971_v56 = vadd.f32 %v1946_v19, %v1945_v7  ;;  %v1961_v42 = vadd.f32 %v1960_v14, %v1959_v55 }
 0x632   : > { %v1894_v26 = vpop.permute.xlu1 %1893 }
 0x633   : > { %v1947_v44 = vmul.f32 %v1894_v26, %v3953_v40  ;;  %v1972_v52 = vrot.slane %v1971_v56, 4  ;;  %v1962_v58 = vrot.slane %v1961_v42, 1 }
 0x635   : > { %v1973_v40 = vadd.f32 %v1972_v52, %v1971_v56  ;;  %v1963_v47 = vadd.f32 %v1962_v58, %v1961_v42  ;;  %v3310_v42 = vld [vmem:[#allocation2 + $0x8] sm:$0xff] }
 0x636   : > { %v1899_v0 = vpop.permute.xlu1 %1898 }
 0x637   : > { %v1948_v20 = vmul.f32 %v1899_v0, %v3950_v30  ;;  %v1965_v30 = vrot.slane %v1964_v38, 4  ;;  %v1974_v60 = vrot.slane %v1973_v40, 2 }
 0x639   : > { %v1909_v13 = vpop.permute.xlu0 %1908  ;;  %v1978_v45 = vadd.f32 %v1948_v20, %v1947_v44  ;;  %v1975_v41 = vadd.f32 %v1974_v60, %v1973_v40  ;;  %v257_v60 = vld [vmem:[#allocation2 + $0x2f8] sm:$0xff] }
 0x63a   : > { %v1904_v5 = vpop.permute.xlu1 %1903  ;;  %v1950_v62 = vmul.f32 %v1909_v13, %v3962_v23  ;;  %v1966_v23 = vadd.f32 %v1965_v30, %v1964_v38 }
 0x63b   : > { %v1949_v28 = vmul.f32 %v1904_v5, %v3967_v2  ;;  %v1979_v2 = vrot.slane %v1978_v45, 4  ;;  %v1976_v13 = vrot.slane %v1975_v41, 1 }
 0x63d   : > { %v1985_v39 = vadd.f32 %v1950_v62, %v1949_v28  ;;  %v1980_v57 = vadd.f32 %v1979_v2, %v1978_v45  ;;  %v1977_v38 = vadd.f32 %v1976_v13, %v1975_v41 }
 0x63f   : > { %v1986_v43 = vrot.slane %v1985_v39, 4  ;;  %v1981_v31 = vrot.slane %v1980_v57, 2 }
 0x640   : > { %v1914_v6 = vpop.permute.xlu1 %1913  ;;  %v1919_v48 = vpop.permute.xlu0 %1918 }
 0x641   : > { %v1951_v32 = vmul.f32 %v1914_v6, %v3991_v37  ;;  %v1952_v15 = vmul.f32 %v1919_v48, %v3984_v35  ;;  %v1987_v4 = vadd.f32 %v1986_v43, %v1985_v39  ;;  %v1967_v35 = vrot.slane %v1966_v23, 2 }
 0x642   : > { %v1982_v27 = vadd.f32 %v1981_v31, %v1980_v57  ;;  %v251_v57 = vld [vmem:[#allocation2 + $0x2c8] sm:$0xff]  ;;  %v258_v31 = vld [vmem:[#allocation2 + $0x300] sm:$0xff] }
 0x643   : > { %v1992_v61 = vadd.f32 %v1952_v15, %v1951_v32  ;;  %v1988_v18 = vrot.slane %v1987_v4, 2  ;;  %v1968_v9 = vadd.f32 %v1967_v35, %v1966_v23  ;;  %v254_v35 = vld [vmem:[#allocation2 + $0x2e0] sm:$0xff] }
 0x644   : > { %v1983_v19 = vrot.slane %v1982_v27, 1 }
 0x645   : > { %v1993_v36 = vrot.slane %v1992_v61, 4  ;;  %v1989_v0 = vadd.f32 %v1988_v18, %v1987_v4  ;;  %v1969_v50 = vrot.slane %v1968_v9, 1  ;;  %v253_v4 = vld [vmem:[#allocation2 + $0x2d8] sm:$0xff]  ;;  %v259_v18 = vld [vmem:[#allocation2 + $0x308] sm:$0xff] }
 0x647   : > { %v1994_v24 = vadd.f32 %v1993_v36, %v1992_v61  ;;  %v1990_v20 = vrot.slane %v1989_v0, 1  ;;  %v1970_v7 = vadd.f32 %v1969_v50, %v1968_v9  ;;  %v260_v9 = vld [vmem:[#allocation2 + $0x310] sm:$0xff] }
 0x648   : > { %v1924_v54 = vpop.permute.xlu1 %1923  ;;  %v1929_v3 = vpop.permute.xlu0 %1928  ;;  %v164_v50 = vld [vmem:[#allocation2 + $0x10] sm:$0xff] }
 0x649   : > { %v1953_v51 = vmul.f32 %v1924_v54, %v4011_v53  ;;  %v1954_v37 = vmul.f32 %v1929_v3, %v4004_v33  ;;  %v1995_v8 = vrot.slane %v1994_v24, 2  ;;  %v1991_v56 = vadd.f32 %v1990_v20, %v1989_v0 }
 0x64a   : > { %v2022_v6 = vsel %vm2021_vm5, %v1970_v7, %v1963_v47 }
 0x64b   : > { %v1999_v1 = vadd.f32 %v1954_v37, %v1953_v51  ;;  %v1996_v49 = vadd.f32 %v1995_v8, %v1994_v24  ;;  %v2024_v32 = vsel %vm2023_vm6, %v1977_v38, %v2022_v6  ;;  %v252_v51 = vld [vmem:[#allocation2 + $0x2d0] sm:$0xff]  ;;  %v3028_v24 = vpack.c.bf16 %v254_v35, %v253_v4 }
 0x64c   : > { %v3025_v37 = vpack.c.bf16 %v252_v51, %v251_v57  ;;  %v3037_v8 = vpack.c.bf16 %v260_v9, %v259_v18 }
 0x64d   : > { %v2000_v11 = vrot.slane %v1999_v1, 4  ;;  %v1997_v28 = vrot.slane %v1996_v49, 1 }
 0x64e   : > { %3026 = vmatpush3.bf16.msra.mxu0 %v3025_v37 }
 0x64f   : > { %v2001_v59 = vadd.f32 %v2000_v11, %v1999_v1  ;;  %v1998_v48 = vadd.f32 %v1997_v28, %v1996_v49  ;;  %3027 = vmatprep.subr.bf16.mxu0 %v3411_v25  ;;  %v256_v1 = vld [vmem:[#allocation2 + $0x2f0] sm:$0xff]  ;;  %v3034_v11 = vpack.c.bf16 %v258_v31, %v257_v60  ;;  %v2126_v49 = vrot.slane %v164_v50, %v282_v22 }
 0x650   : > { %v1939_v10 = vpop.permute.xlu0 %1938  ;;  %v1934_v34 = vpop.permute.xlu1 %1933  ;;  %v3031_v14 = vpack.c.bf16 %v256_v1, %v255_v16 }
 0x651   : > { %v2002_v53 = vrot.slane %v2001_v59, 2  ;;  %v1956_v33 = vmul.f32 %v1939_v10, %v4024_v12  ;;  %v1955_v26 = vmul.f32 %v1934_v34, %v4031_v46  ;;  %v1984_v12 = vadd.f32 %v1983_v19, %v1982_v27 }
 0x652   : > { %3029 = vmatpush3.bf16.msra.mxu0 %v3028_v24 }
 0x653   : > { %v2006_v5 = vadd.f32 %v1956_v33, %v1955_v26  ;;  %v2003_v63 = vadd.f32 %v2002_v53, %v2001_v59  ;;  %v2026_v39 = vsel %vm2025_vm7, %v1984_v12, %v2024_v32  ;;  %3030 = vmatprep.subr.bf16.mxu0 %v3411_v25  ;;  %v2045_v59 = vsub.s32 7, %v3552_v21 }
 0x654   : > { %v2028_v61 = vsel %vm2027_vm8, %v1991_v56, %v2026_v39 }
 0x655   : > { %v2007_v29 = vrot.slane %v2006_v5, 4  ;;  %v2004_v44 = vrot.slane %v2003_v63, 1  ;;  %v2030_v17 = vsel %vm2029_vm9, %v1998_v48, %v2028_v61  ;;  %v2046_v41 = vrot.slane %v3310_v42, %v2045_v59 }
 0x656   : > { %3032 = vmatpush3.bf16.msra.mxu0 %v3031_v14 }
 0x657   : > { %v2008_v62 = vadd.f32 %v2007_v29, %v2006_v5  ;;  %v2005_v15 = vadd.f32 %v2004_v44, %v2003_v63  ;;  %3033 = vmatprep.subr.bf16.mxu0 %v3411_v25 }
 0x659   : > { %v2009_v46 = vrot.slane %v2008_v62, 2  ;;  %v2032_v2 = vsel %vm2031_vm10, %v2005_v15, %v2030_v17 }
 0x65a   : > { %3035 = vmatpush3.bf16.msra.mxu0 %v3034_v11 }
 0x65b   : > { %v2010_v45 = vadd.f32 %v2009_v46, %v2008_v62  ;;  %3036 = vmatprep.subr.bf16.mxu0 %v3411_v25 }
 0x65d   : > { %v2011_v30 = vrot.slane %v2010_v45, 1 }
 0x65e   : > { %3038 = vmatpush3.bf16.msra.mxu0 %v3037_v8 }
 0x65f   : > { %v2012_v52 = vadd.f32 %v2011_v30, %v2010_v45 }
 0x661   : > { %v2034_v43 = vsel %vm2033_vm11, %v2012_v52, %v2032_v2 }
 0x662   : > { %v2036_v23 = vsel %vm263_vm1, %v2034_v43, 0.0 }
 0x663   : > { %v2038_v36 = vmin.f32 %v2036_v23, 0.0  ;;  %vm2037_vm12 = vcmp.gt.f32.partialorder %v2036_v23, 0.0 }
 0x665   : > { %v2039_v55 = vmul.f32 1.442695, %v2038_v36 }
 0x667   : > { %3305 = vpow2.f32 %v2039_v55 }
 0x671   : > { %v3306_v40 = vpop.eup %3305 }
 0x672   : > { %v2357_v54 = vadd.f32 -1.0, %v3306_v40 }
 0x674   : > { %v2042_v3 = vsel %vm2037_vm12, %v2036_v23, %v2357_v54 }
 0x675   : > { %2826 = vmatmul.mubr.f32.vlgmr.msra.gmra.mrb[32].mxu1 %v2042_v3 }
 0x748   : > { %v2113_v10 = vpop.f32.mrb[32].mxu1 }
 0x749   : > { %v2114_v34 = vadd.f32 %v2113_v10, %v2046_v41  ;;  %v2827_v27 = vpop.f32.mrb[33].mxu1 }
 0x74b   : > { %v2118_v53 = vmin.f32 %v2114_v34, 0.0  ;;  %vm2117_vm1 = vcmp.gt.f32.partialorder %v2114_v34, 0.0 }
 0x74d   : > { %v2119_v33 = vmul.f32 1.442695, %v2118_v53 }
 0x74f   : > { %3307 = vpow2.f32 %v2119_v33 }
 0x759   : > { %v3308_v26 = vpop.eup %3307 }
 0x75a   : > { %v2358_v0 = vadd.f32 -1.0, %v3308_v26 }
 0x75c   : > { %v2122_v25 = vsel %vm2117_vm1, %v2114_v34, %v2358_v0 }
 0x75d   : > { %2861 = vmatmul.mubr.f32.vlgmr.msra.gmra.mrb[48].mxu0 %v2122_v25 }
 0x830   : > { %v2193_v5 = vpop.f32.mrb[48].mxu0 }
 0x831   : > { %v2194_v13 = vadd.f32 %v2193_v5, %v2126_v49  ;;  %v2862_v63 = vpop.f32.mrb[49].mxu0 }
 0x833   : > { %2197 = vst [vmem:[%s154_s26] sm:$0xff] %v2194_v13 }
 0x834   : > { %3352 = shalt.err (!%p3349_p7)
}
 0x835   : > { %s3353_s7 = scalar_lea.hbm %s4119_s30, 128  ;;  %s3357_s16 = scalar_lea.hbm %s4163_s2, 512 }
 0x836   : > { %p3354_p8 = scmp.ne.s32.totalorder %s4119_s30, %s3353_s7  ;;  %p3358_p1 = scmp.lt.u32.totalorder %s4119_s30, %s4163_s2 }
 0x837   : > { %p3359_p0 = scmp.lt.u32.totalorder %s3357_s16, %s3353_s7  ;;  %p3361_p6 = scmp.lt.u32.totalorder %s3353_s7, %s4119_s30 }
 0x838   : > { %p3355_p11 = pnand %p3354_p8, %p4174_p9 }
 0x839   : > { %p3360_p5 = por %p3359_p0, %p3358_p1 }
 0x83a   : > { %p3356_p13 = pneg %p3355_p11 }
 0x83b   : > { %p3362_p10 = por %p3361_p6, %p3360_p5 }
 0x83d   : > { %p3363_p12 = pnand %p3362_p10, %p3356_p13 }
 0x83f   : > { %3366 = shalt.err (!%p3363_p12)
}
 0x840   : > { %3043 = dma.vmem_to_hbm [thread:$0]  (%p4174_p9), %s4121_s27, 128, %s4119_s30, %s2199_s3  }
 0x841 PF: > { %p3055_p2 = scmp.ge.s32.totalorder %s3405_s12, 2  ;;  %s2224_s24 = sand.u32 1, %s3393_s9  }
 0x842   : > { %p4175_p3 = scmp.ne.s32.totalorder %s4168_s20, 0  ;;  %s2225_s21 = scalar_lea.sflag [#allocation4], %s2224_s24 }
 0x844   : > { %p3050_p4 = pnand %p3055_p2, %p4175_p3 }
 0x846   : > { %3388 = dma.done.wait (!%p3050_p4), %s2225_s21, 128  }
 0x847   : > { %3390 = vsyncadd (!%p3050_p4), %s2225_s21, 4294967168  ;;  %p13_p7 = scmp.ge.s32.totalorder %s3455_s15, 6   ;;  %s4176_s9 = smov %s3397_s10 }
 0x848   : > { %s4177_s10 = smov %s3401_s11  ;;  %s4178_s11 = smov %s3466_s18 }
 0x849   : > { %s4179_s12 = smov %s3455_s15  ;;  %15 = sbr.rel (!%p13_p7) target bundleno = 4 (0x4), region = 68 }
 0x850   :  { %2230 = vsyncpa [#allocation3], 1 }
 0x851   :  { %2232 = vsyncpa [#allocation3 + $0x1], 1 }
 0x852   :  { %2233 = vsyncpa [#allocation4], 1 }
 0x853   :  { %2235 = vsyncpa [#allocation4 + $0x1], 1 }

</bundles_post_ra>
